<compile_context>
chip_gen: v7x
topology: tpu7x:2x2x1
jax: 0.10.0
libtpu: 0.0.40
codegen_flags: <defaults>
</compile_context>

<pallas_src>
import jax
import jax.numpy as jnp
from jax import lax
from jax.experimental import pallas as pl
from jax.experimental.pallas import tpu as pltpu


# ---------------------------------------------------------------------------
# Fused Pallas kernel (all layers + FC + softmax, everything VMEM-resident)
# ---------------------------------------------------------------------------
def _make_fused_kernel(n_layers, seq, batch, hidden):
    H = hidden
    H2 = 2 * H
    H8 = 8 * H
    n_in = 1 + 5 * n_layers + 2   # x, per-layer (w_in, b_in, w_hh, h0, c0), fc_w, fc_b

    def kernel(*refs):
        x_ref = refs[0]
        layer_refs = [refs[1 + 5 * l: 1 + 5 * (l + 1)] for l in range(n_layers)]
        wfc_ref = refs[1 + 5 * n_layers]
        bfc_ref = refs[2 + 5 * n_layers]
        out_ref = refs[n_in]
        xm_sc = refs[n_in + 1]    # (seq*batch, 8H) current layer's MERGED hoisted projection
        buf_sc = refs[n_in + 2]   # (seq*batch, 2H) previous layer's [fwd|bwd] outputs

        # Column c of the packed 8H gate vector belongs to the forward direction iff (c mod 2H) < H.
        col = lax.broadcasted_iota(jnp.int32, (1, H8), 1)
        if (H2 & (H2 - 1)) == 0:
            fwd_mask = (col & (H2 - 1)) < H
        else:
            fwd_mask = (col % H2) < H

        last_fwd = None
        last_bwd = None

        for l in range(n_layers):
            w_in_ref, b_in_ref, w_hh_ref, h0_ref, c0_ref = layer_refs[l]
            is_last = (l == n_layers - 1)

            # --- hoisted input projection: ONE matmul over the whole sequence, both directions ---
            src_vals = x_ref[...] if l == 0 else buf_sc[...]
            xp = (jnp.dot(src_vals, w_in_ref[...], preferred_element_type=jnp.float32)
                  + b_in_ref[...])                                    # (seq*batch, 8H)

            # --- pre-merge fwd/bwd time indexing ONCE, off the recurrence chain ---
            # xmerged[s] = fwd-columns of xp[s]  |  bwd-columns of xp[seq-1-s]
            for s in range(seq):
                xm_sc[s * batch:(s + 1) * batch, :] = jnp.where(
                    fwd_mask,
                    xp[s * batch:(s + 1) * batch, :],
                    xp[(seq - 1 - s) * batch:(seq - s) * batch, :])

            # --- interleaved fwd/bwd recurrence; h/c stay in vregs (no VMEM round trip) ---
            w_hh = w_hh_ref[...]           # hoisted: read the (2H, 8H) weight once per layer
            h = h0_ref[...]                # (batch, 2H) = [h_fwd | h_bwd]
            c = c0_ref[...]
            for s in range(seq):           # fully unrolled (seq static & small)
                gates = (jnp.dot(h, w_hh, preferred_element_type=jnp.float32)
                         + xm_sc[s * batch:(s + 1) * batch, :])       # (batch, 8H)

                # packed column order is [i_f i_b | f_f f_b | o_f o_b | g_f g_b]:
                # sigmoid on the first 6H columns, tanh on the last 2H only.
                sig = jax.nn.sigmoid(gates[:, 0:3 * H2])
                g_g = jnp.tanh(gates[:, 3 * H2:H8])
                i_g = sig[:, 0 * H2:1 * H2]
                f_g = sig[:, 1 * H2:2 * H2]
                o_g = sig[:, 2 * H2:3 * H2]

                c = f_g * c + i_g * g_g
                h = o_g * jnp.tanh(c)

                if is_last:
                    if s == 0:
                        # backward-direction output at original time seq-1 (its first step)
                        last_bwd = h[:, H:H2]
                else:
                    # NOTE: could be hidden under the recurrence by accumulating the next layer's
                    # projection here (MXU idle between recurrent matmuls); kept simple at this size.
                    buf_sc[s * batch:(s + 1) * batch, 0:H] = h[:, 0:H]
                    buf_sc[(seq - 1 - s) * batch:(seq - s) * batch, H:H2] = h[:, H:H2]

            if is_last:
                last_fwd = h[:, 0:H]       # forward-direction output at time seq-1

        # --- FC(2H -> 3) + softmax on output[:, -1, :] ---
        final = jnp.concatenate([last_fwd, last_bwd], axis=1)         # (batch, 2H)
        logits = (jnp.dot(final, wfc_ref[...], preferred_element_type=jnp.float32)
                  + bfc_ref[...])
        m = jnp.max(logits, axis=1, keepdims=True)
        e = jnp.exp(logits - m)
        out_ref[...] = e / jnp.sum(e, axis=1, keepdims=True)

    return kernel, n_in


# ---------------------------------------------------------------------------
# Forward pass wrapper (single pallas_call; batch padded to the 8-row sublane tile)
# ---------------------------------------------------------------------------
@jax.jit
def text_model_forward(x, params, h0, c0):
    """x: (batch, seq, source_size); h0/c0: (2*n_layers, batch, hidden) as in init_lstm_para()."""
    n_layers = len(params['layers'])
    batch, seq, src = x.shape
    hidden = h0.shape[-1]

    # Pad batch to a full f32 sublane tile (8 rows): free throughput, chain length unchanged.
    batch_p = ((batch + 7) // 8) * 8
    pad = batch_p - batch
    x_p = jnp.pad(x.astype(jnp.float32), ((0, pad), (0, 0), (0, 0)))
    h0_p = jnp.pad(h0, ((0, 0), (0, pad), (0, 0)))
    c0_p = jnp.pad(c0, ((0, 0), (0, pad), (0, 0)))

    # (batch_p, seq, src) -> (seq*batch_p, src): rows [s*batch_p:(s+1)*batch_p] hold timestep s.
    x2d = jnp.transpose(x_p, (1, 0, 2)).reshape(seq * batch_p, src)

    flat = [x2d]
    for l in range(n_layers):
        w_in, b_in, w_hh = params['layers'][l]
        h0_l = jnp.concatenate([h0_p[2 * l], h0_p[2 * l + 1]], axis=-1)    # (batch_p, 2H) = [fwd|bwd]
        c0_l = jnp.concatenate([c0_p[2 * l], c0_p[2 * l + 1]], axis=-1)
        flat += [w_in, b_in, w_hh, h0_l, c0_l]
    flat += [params['fc'][0], params['fc'][1]]

    kernel, n_in = _make_fused_kernel(n_layers, seq, batch_p, hidden)
    vmem = pl.BlockSpec(memory_space=pltpu.MemorySpace.VMEM)
    out = pl.pallas_call(
        kernel,
        out_shape=jax.ShapeDtypeStruct((batch_p, 3), jnp.float32),
        in_specs=[vmem] * n_in,
        out_specs=vmem,
        scratch_shapes=[
            pltpu.VMEM((seq * batch_p, 8 * hidden), jnp.float32),   # merged input projection
            pltpu.VMEM((seq * batch_p, 2 * hidden), jnp.float32),   # previous layer's outputs
        ],
        compiler_params=pltpu.CompilerParams(vmem_limit_bytes=32 * 1024 * 1024),
    )(*flat)

    out = out[:batch]        # drop padded rows
    if out.shape[0] == 1:    # torch .squeeze(0) semantics
        out = out[0]
    return out


# ---------------------------------------------------------------------------
# Parameter construction: PyTorch-shaped weights, then packed into fused layout
# ---------------------------------------------------------------------------
def init_params(key, config):
    src = config['source_size']
    H = config['lstm_hidden_size']
    n_layers = config['lstm_num_layers']
    bound = 1.0 / (H ** 0.5)

    def uniform(k, shape, b):
        return jax.random.uniform(k, shape, jnp.float32, -b, b)

    def pack_cols(fwd_t, bwd_t):
        # fwd_t/bwd_t: (rows, 4H) in torch [i|f|g|o] order
        # -> (rows, 8H) in [i_f i_b | f_f f_b | o_f o_b | g_f g_b] order
        #    (sigmoid group contiguous in the first 6H cols, tanh group in the last 2H cols).
        blocks = []
        for k in (0, 1, 3, 2):    # i, f, o, g
            blocks.append(fwd_t[:, k * H:(k + 1) * H])
            blocks.append(bwd_t[:, k * H:(k + 1) * H])
        return jnp.concatenate(blocks, axis=1)

    packed = {'layers': []}
    raw = {'layers': []}
    for l in range(n_layers):
        in_dim = src if l == 0 else 2 * H
        raw_dirs = {}
        for d in ('fwd', 'bwd'):
            key, k1, k2, k3, k4 = jax.random.split(key, 5)
            w_ih = uniform(k1, (4 * H, in_dim), bound)   # torch weight_ih_l{k}[_reverse]
            w_hh = uniform(k2, (4 * H, H), bound)        # torch weight_hh_l{k}[_reverse]
            b_ih = uniform(k3, (4 * H,), bound)
            b_hh = uniform(k4, (4 * H,), bound)
            raw_dirs[d] = (w_ih, w_hh, b_ih, b_hh)
        raw['layers'].append(raw_dirs)

        wih_f, whh_f, bih_f, bhh_f = raw_dirs['fwd']
        wih_b, whh_b, bih_b, bhh_b = raw_dirs['bwd']

        w_in = pack_cols(wih_f.T, wih_b.T)                                    # (in_dim, 8H)
        b_in = pack_cols((bih_f + bhh_f).reshape(1, 4 * H),
                         (bih_b + bhh_b).reshape(1, 4 * H))                   # (1, 8H)
        zeros4 = jnp.zeros((H, 4 * H), jnp.float32)
        fwd_part = jnp.concatenate([whh_f.T, zeros4], axis=0)                 # (2H, 4H)
        bwd_part = jnp.concatenate([zeros4, whh_b.T], axis=0)                 # (2H, 4H)
        w_hh_bd = pack_cols(fwd_part, bwd_part)                               # (2H, 8H) block-diagonal
        packed['layers'].append((w_in, b_in, w_hh_bd))

    key, kw, kb = jax.random.split(key, 3)
    fc_bound = 1.0 / ((2 * H) ** 0.5)
    w_fc = uniform(kw, (3, 2 * H), fc_bound)     # torch nn.Linear(2H, 3).weight
    b_fc = uniform(kb, (3,), fc_bound)
    raw['fc'] = (w_fc, b_fc)
    packed['fc'] = (w_fc.T, b_fc.reshape(1, 3))
    return packed, raw


# ---------------------------------------------------------------------------
# Pure-JAX reference (mirrors nn.LSTM / nn.Linear / Softmax semantics exactly)
# ---------------------------------------------------------------------------
def reference_forward(x, raw, h0, c0):
    hp = jax.lax.Precision.HIGHEST

    def run_dir(xs, w_ih, w_hh, b_ih, b_hh, h_init, c_init):
        H = w_hh.shape[1]

        def step(carry, x_t):
            h, c = carry
            gates = (jnp.matmul(x_t, w_ih.T, precision=hp)
                     + jnp.matmul(h, w_hh.T, precision=hp) + b_ih + b_hh)
            i = jax.nn.sigmoid(gates[:, 0:H])
            f = jax.nn.sigmoid(gates[:, H:2 * H])
            g = jnp.tanh(gates[:, 2 * H:3 * H])
            o = jax.nn.sigmoid(gates[:, 3 * H:4 * H])
            c = f * c + i * g
            h = o * jnp.tanh(c)
            return (h, c), h

        _, hs = lax.scan(step, (h_init, c_init), xs)
        return hs                                   # (seq, batch, H)

    layer_in = jnp.transpose(x, (1, 0, 2))          # (seq, batch, feat)
    for l, dirs in enumerate(raw['layers']):
        fwd = run_dir(layer_in, *dirs['fwd'], h0[2 * l], c0[2 * l])
        bwd = run_dir(layer_in[::-1], *dirs['bwd'], h0[2 * l + 1], c0[2 * l + 1])[::-1]
        layer_in = jnp.concatenate([fwd, bwd], axis=-1)
    last = layer_in[-1]                             # output[:, -1, :]
    w_fc, b_fc = raw['fc']
    logits = jnp.matmul(last, w_fc.T, precision=hp) + b_fc
    return jax.nn.softmax(logits, axis=1)


# ---------------------------------------------------------------------------
if __name__ == "__main__":
    config = {
        'source_size': 16,
        'lstm_hidden_size': 32,
        'lstm_num_layers': 2,
        'lstm_dropout': 0.0,
    }
    batch = 2
    seq_len = 8

    key = jax.random.PRNGKey(0)
    k_params, k_x, k_h, k_c = jax.random.split(key, 4)

    packed_params, raw_params = init_params(k_params, config)
    x = jax.random.normal(k_x, (batch, seq_len, config['source_size']), jnp.float32)

    # init_lstm_para(): torch.randn(num_layers*2, batch, hidden) -- deterministic here.
    h0 = jax.random.normal(
        k_h, (config['lstm_num_layers'] * 2, batch, config['lstm_hidden_size']), jnp.float32)
    c0 = jax.random.normal(
        k_c, (config['lstm_num_layers'] * 2, batch, config['lstm_hidden_size']), jnp.float32)

    out = jax.block_until_ready(text_model_forward(x, packed_params, h0, c0))
    ref = jax.block_until_ready(reference_forward(x, raw_params, h0, c0))

    assert out.shape == (batch, 3), out.shape
    assert bool(jnp.all(jnp.isfinite(out)))
    # softmax rows sum to 1
    assert bool(jnp.all(jnp.abs(jnp.sum(out, axis=1) - 1.0) < 1e-5))
    # matches the straightforward bidirectional-LSTM reference (tolerance covers MXU precision)
    assert bool(jnp.allclose(out, ref, atol=3e-2, rtol=0.0)), (out, ref)

    print("KERNEL_OK")
</pallas_src>

<mosaic_0001>
module attributes {stable_mosaic.version = 11 : i64} {
  func.func @kernel(%arg0: memref<64x16xf32, #tpu.memory_space<vmem>>, %arg1: memref<16x256xf32, #tpu.memory_space<vmem>>, %arg2: memref<1x256xf32, #tpu.memory_space<vmem>>, %arg3: memref<64x256xf32, #tpu.memory_space<vmem>>, %arg4: memref<8x64xf32, #tpu.memory_space<vmem>>, %arg5: memref<8x64xf32, #tpu.memory_space<vmem>>, %arg6: memref<64x256xf32, #tpu.memory_space<vmem>>, %arg7: memref<1x256xf32, #tpu.memory_space<vmem>>, %arg8: memref<64x256xf32, #tpu.memory_space<vmem>>, %arg9: memref<8x64xf32, #tpu.memory_space<vmem>>, %arg10: memref<8x64xf32, #tpu.memory_space<vmem>>, %arg11: memref<64x3xf32, #tpu.memory_space<vmem>>, %arg12: memref<1x3xf32, #tpu.memory_space<vmem>>, %arg13: memref<8x3xf32, #tpu.memory_space<vmem>>, %arg14: memref<64x256xf32, #tpu.memory_space<vmem>>, %arg15: memref<64x64xf32, #tpu.memory_space<vmem>>) attributes {dimension_semantics = [], scalar_prefetch = 0 : i64, scratch_operands = 2 : i64, tpu.core_type = #tpu.core_type<tc>} {
    %0 = tpu.iota {dimensions = array<i32: 1>} : vector<1x256xi32>
    %c63_i32 = arith.constant 63 : i32
    %1 = vector.broadcast %c63_i32 : i32 to vector<1x256xi32>
    %2 = arith.andi %0, %1 : vector<1x256xi32>
    %c32_i32 = arith.constant 32 : i32
    %3 = vector.broadcast %c32_i32 : i32 to vector<1x256xi32>
    %4 = arith.cmpi slt, %2, %3 : vector<1x256xi32>
    %c0 = arith.constant 0 : index
    %c0_0 = arith.constant 0 : index
    %5 = vector.load %arg0[%c0, %c0_0] : memref<64x16xf32, #tpu.memory_space<vmem>>, vector<64x16xf32>
    %c0_1 = arith.constant 0 : index
    %c0_2 = arith.constant 0 : index
    %6 = vector.load %arg1[%c0_1, %c0_2] : memref<16x256xf32, #tpu.memory_space<vmem>>, vector<16x256xf32>
    %cst = arith.constant dense<0.000000e+00> : vector<64x256xf32>
    %7 = tpu.matmul %5, %6, %cst {dimension_numbers = #tpu.dot_dimension_numbers<[1], [0], [0], [1], [0, 0, 1, 1], [], []>} : vector<64x16xf32>, vector<16x256xf32>, vector<64x256xf32> -> vector<64x256xf32>
    %c0_3 = arith.constant 0 : index
    %c0_4 = arith.constant 0 : index
    %8 = vector.load %arg2[%c0_3, %c0_4] : memref<1x256xf32, #tpu.memory_space<vmem>>, vector<1x256xf32>
    %9 = vector.broadcast %8 : vector<1x256xf32> to vector<64x256xf32>
    %10 = arith.addf %7, %9 : vector<64x256xf32>
    %11 = vector.extract_strided_slice %10 {offsets = [0, 0], sizes = [8, 256], strides = [1, 1]} : vector<64x256xf32> to vector<8x256xf32>
    %12 = vector.extract_strided_slice %10 {offsets = [56, 0], sizes = [8, 256], strides = [1, 1]} : vector<64x256xf32> to vector<8x256xf32>
    %13 = vector.shape_cast %4 : vector<1x256xi1> to vector<1x256xi1>
    %14 = vector.broadcast %13 : vector<1x256xi1> to vector<8x256xi1>
    %15 = arith.select %14, %11, %12 : vector<8x256xi1>, vector<8x256xf32>
    %c0_5 = arith.constant 0 : index
    %c0_6 = arith.constant 0 : index
    %16 = vector.load %arg14[%c0_5, %c0_6] : memref<64x256xf32, #tpu.memory_space<vmem>>, vector<8x256xf32>
    tpu.vector_store %arg14[%c0_5, %c0_6], %15 {strides = array<i32>} : memref<64x256xf32, #tpu.memory_space<vmem>>, vector<8x256xf32>,
    %17 = vector.extract_strided_slice %10 {offsets = [8, 0], sizes = [8, 256], strides = [1, 1]} : vector<64x256xf32> to vector<8x256xf32>
    %18 = vector.extract_strided_slice %10 {offsets = [48, 0], sizes = [8, 256], strides = [1, 1]} : vector<64x256xf32> to vector<8x256xf32>
    %19 = vector.shape_cast %4 : vector<1x256xi1> to vector<1x256xi1>
    %20 = vector.broadcast %19 : vector<1x256xi1> to vector<8x256xi1>
    %21 = arith.select %20, %17, %18 : vector<8x256xi1>, vector<8x256xf32>
    %c8 = arith.constant 8 : index
    %c0_7 = arith.constant 0 : index
    %22 = vector.load %arg14[%c8, %c0_7] : memref<64x256xf32, #tpu.memory_space<vmem>>, vector<8x256xf32>
    tpu.vector_store %arg14[%c8, %c0_7], %21 {strides = array<i32>} : memref<64x256xf32, #tpu.memory_space<vmem>>, vector<8x256xf32>,
    %23 = vector.extract_strided_slice %10 {offsets = [16, 0], sizes = [8, 256], strides = [1, 1]} : vector<64x256xf32> to vector<8x256xf32>
    %24 = vector.extract_strided_slice %10 {offsets = [40, 0], sizes = [8, 256], strides = [1, 1]} : vector<64x256xf32> to vector<8x256xf32>
    %25 = vector.shape_cast %4 : vector<1x256xi1> to vector<1x256xi1>
    %26 = vector.broadcast %25 : vector<1x256xi1> to vector<8x256xi1>
    %27 = arith.select %26, %23, %24 : vector<8x256xi1>, vector<8x256xf32>
    %c16 = arith.constant 16 : index
    %c0_8 = arith.constant 0 : index
    %28 = vector.load %arg14[%c16, %c0_8] : memref<64x256xf32, #tpu.memory_space<vmem>>, vector<8x256xf32>
    tpu.vector_store %arg14[%c16, %c0_8], %27 {strides = array<i32>} : memref<64x256xf32, #tpu.memory_space<vmem>>, vector<8x256xf32>,
    %29 = vector.extract_strided_slice %10 {offsets = [24, 0], sizes = [8, 256], strides = [1, 1]} : vector<64x256xf32> to vector<8x256xf32>
    %30 = vector.extract_strided_slice %10 {offsets = [32, 0], sizes = [8, 256], strides = [1, 1]} : vector<64x256xf32> to vector<8x256xf32>
    %31 = vector.shape_cast %4 : vector<1x256xi1> to vector<1x256xi1>
    %32 = vector.broadcast %31 : vector<1x256xi1> to vector<8x256xi1>
    %33 = arith.select %32, %29, %30 : vector<8x256xi1>, vector<8x256xf32>
    %c24 = arith.constant 24 : index
    %c0_9 = arith.constant 0 : index
    %34 = vector.load %arg14[%c24, %c0_9] : memref<64x256xf32, #tpu.memory_space<vmem>>, vector<8x256xf32>
    tpu.vector_store %arg14[%c24, %c0_9], %33 {strides = array<i32>} : memref<64x256xf32, #tpu.memory_space<vmem>>, vector<8x256xf32>,
    %35 = vector.extract_strided_slice %10 {offsets = [32, 0], sizes = [8, 256], strides = [1, 1]} : vector<64x256xf32> to vector<8x256xf32>
    %36 = vector.extract_strided_slice %10 {offsets = [24, 0], sizes = [8, 256], strides = [1, 1]} : vector<64x256xf32> to vector<8x256xf32>
    %37 = vector.shape_cast %4 : vector<1x256xi1> to vector<1x256xi1>
    %38 = vector.broadcast %37 : vector<1x256xi1> to vector<8x256xi1>
    %39 = arith.select %38, %35, %36 : vector<8x256xi1>, vector<8x256xf32>
    %c32 = arith.constant 32 : index
    %c0_10 = arith.constant 0 : index
    %40 = vector.load %arg14[%c32, %c0_10] : memref<64x256xf32, #tpu.memory_space<vmem>>, vector<8x256xf32>
    tpu.vector_store %arg14[%c32, %c0_10], %39 {strides = array<i32>} : memref<64x256xf32, #tpu.memory_space<vmem>>, vector<8x256xf32>,
    %41 = vector.extract_strided_slice %10 {offsets = [40, 0], sizes = [8, 256], strides = [1, 1]} : vector<64x256xf32> to vector<8x256xf32>
    %42 = vector.extract_strided_slice %10 {offsets = [16, 0], sizes = [8, 256], strides = [1, 1]} : vector<64x256xf32> to vector<8x256xf32>
    %43 = vector.shape_cast %4 : vector<1x256xi1> to vector<1x256xi1>
    %44 = vector.broadcast %43 : vector<1x256xi1> to vector<8x256xi1>
    %45 = arith.select %44, %41, %42 : vector<8x256xi1>, vector<8x256xf32>
    %c40 = arith.constant 40 : index
    %c0_11 = arith.constant 0 : index
    %46 = vector.load %arg14[%c40, %c0_11] : memref<64x256xf32, #tpu.memory_space<vmem>>, vector<8x256xf32>
    tpu.vector_store %arg14[%c40, %c0_11], %45 {strides = array<i32>} : memref<64x256xf32, #tpu.memory_space<vmem>>, vector<8x256xf32>,
    %47 = vector.extract_strided_slice %10 {offsets = [48, 0], sizes = [8, 256], strides = [1, 1]} : vector<64x256xf32> to vector<8x256xf32>
    %48 = vector.extract_strided_slice %10 {offsets = [8, 0], sizes = [8, 256], strides = [1, 1]} : vector<64x256xf32> to vector<8x256xf32>
    %49 = vector.shape_cast %4 : vector<1x256xi1> to vector<1x256xi1>
    %50 = vector.broadcast %49 : vector<1x256xi1> to vector<8x256xi1>
    %51 = arith.select %50, %47, %48 : vector<8x256xi1>, vector<8x256xf32>
    %c48 = arith.constant 48 : index
    %c0_12 = arith.constant 0 : index
    %52 = vector.load %arg14[%c48, %c0_12] : memref<64x256xf32, #tpu.memory_space<vmem>>, vector<8x256xf32>
    tpu.vector_store %arg14[%c48, %c0_12], %51 {strides = array<i32>} : memref<64x256xf32, #tpu.memory_space<vmem>>, vector<8x256xf32>,
    %53 = vector.extract_strided_slice %10 {offsets = [56, 0], sizes = [8, 256], strides = [1, 1]} : vector<64x256xf32> to vector<8x256xf32>
    %54 = vector.extract_strided_slice %10 {offsets = [0, 0], sizes = [8, 256], strides = [1, 1]} : vector<64x256xf32> to vector<8x256xf32>
    %55 = vector.shape_cast %4 : vector<1x256xi1> to vector<1x256xi1>
    %56 = vector.broadcast %55 : vector<1x256xi1> to vector<8x256xi1>
    %57 = arith.select %56, %53, %54 : vector<8x256xi1>, vector<8x256xf32>
    %c56 = arith.constant 56 : index
    %c0_13 = arith.constant 0 : index
    %58 = vector.load %arg14[%c56, %c0_13] : memref<64x256xf32, #tpu.memory_space<vmem>>, vector<8x256xf32>
    tpu.vector_store %arg14[%c56, %c0_13], %57 {strides = array<i32>} : memref<64x256xf32, #tpu.memory_space<vmem>>, vector<8x256xf32>,
    %c0_14 = arith.constant 0 : index
    %c0_15 = arith.constant 0 : index
    %59 = vector.load %arg3[%c0_14, %c0_15] : memref<64x256xf32, #tpu.memory_space<vmem>>, vector<64x256xf32>
    %c0_16 = arith.constant 0 : index
    %c0_17 = arith.constant 0 : index
    %60 = vector.load %arg4[%c0_16, %c0_17] : memref<8x64xf32, #tpu.memory_space<vmem>>, vector<8x64xf32>
    %c0_18 = arith.constant 0 : index
    %c0_19 = arith.constant 0 : index
    %61 = vector.load %arg5[%c0_18, %c0_19] : memref<8x64xf32, #tpu.memory_space<vmem>>, vector<8x64xf32>
    %cst_20 = arith.constant dense<0.000000e+00> : vector<8x256xf32>
    %62 = tpu.matmul %60, %59, %cst_20 {dimension_numbers = #tpu.dot_dimension_numbers<[1], [0], [0], [1], [0, 0, 1, 1], [], []>} : vector<8x64xf32>, vector<64x256xf32>, vector<8x256xf32> -> vector<8x256xf32>
    %c0_21 = arith.constant 0 : index
    %c0_22 = arith.constant 0 : index
    %63 = vector.load %arg14[%c0_21, %c0_22] : memref<64x256xf32, #tpu.memory_space<vmem>>, vector<8x256xf32>
    %64 = arith.addf %62, %63 : vector<8x256xf32>
    %65 = vector.extract_strided_slice %64 {offsets = [0, 0], sizes = [8, 192], strides = [1, 1]} : vector<8x256xf32> to vector<8x192xf32>
    %66 = arith.negf %65 : vector<8x192xf32>
    %67 = math.exp %66 : vector<8x192xf32>
    %cst_23 = arith.constant 1.000000e+00 : f32
    %68 = vector.broadcast %cst_23 : f32 to vector<8x192xf32>
    %69 = arith.addf %68, %67 : vector<8x192xf32>
    %70 = arith.divf %68, %69 : vector<8x192xf32>
    %71 = vector.extract_strided_slice %64 {offsets = [0, 192], sizes = [8, 64], strides = [1, 1]} : vector<8x256xf32> to vector<8x64xf32>
    %72 = math.tanh %71 : vector<8x64xf32>
    %73 = vector.extract_strided_slice %70 {offsets = [0, 0], sizes = [8, 64], strides = [1, 1]} : vector<8x192xf32> to vector<8x64xf32>
    %74 = vector.extract_strided_slice %70 {offsets = [0, 64], sizes = [8, 64], strides = [1, 1]} : vector<8x192xf32> to vector<8x64xf32>
    %75 = vector.extract_strided_slice %70 {offsets = [0, 128], sizes = [8, 64], strides = [1, 1]} : vector<8x192xf32> to vector<8x64xf32>
    %76 = arith.mulf %74, %61 : vector<8x64xf32>
    %77 = arith.mulf %73, %72 : vector<8x64xf32>
    %78 = arith.addf %76, %77 : vector<8x64xf32>
    %79 = math.tanh %78 : vector<8x64xf32>
    %80 = arith.mulf %75, %79 : vector<8x64xf32>
    %81 = vector.extract_strided_slice %80 {offsets = [0, 0], sizes = [8, 32], strides = [1, 1]} : vector<8x64xf32> to vector<8x32xf32>
    %c0_24 = arith.constant 0 : index
    %c0_25 = arith.constant 0 : index
    %82 = vector.load %arg15[%c0_24, %c0_25] : memref<64x64xf32, #tpu.memory_space<vmem>>, vector<8x32xf32>
    tpu.vector_store %arg15[%c0_24, %c0_25], %81 {strides = array<i32>} : memref<64x64xf32, #tpu.memory_space<vmem>>, vector<8x32xf32>,
    %83 = vector.extract_strided_slice %80 {offsets = [0, 32], sizes = [8, 32], strides = [1, 1]} : vector<8x64xf32> to vector<8x32xf32>
    %c56_26 = arith.constant 56 : index
    %c32_27 = arith.constant 32 : index
    %84 = vector.load %arg15[%c56_26, %c32_27] : memref<64x64xf32, #tpu.memory_space<vmem>>, vector<8x32xf32>
    tpu.vector_store %arg15[%c56_26, %c32_27], %83 {strides = array<i32>} : memref<64x64xf32, #tpu.memory_space<vmem>>, vector<8x32xf32>,
    %cst_28 = arith.constant dense<0.000000e+00> : vector<8x256xf32>
    %85 = tpu.matmul %80, %59, %cst_28 {dimension_numbers = #tpu.dot_dimension_numbers<[1], [0], [0], [1], [0, 0, 1, 1], [], []>} : vector<8x64xf32>, vector<64x256xf32>, vector<8x256xf32> -> vector<8x256xf32>
    %c8_29 = arith.constant 8 : index
    %c0_30 = arith.constant 0 : index
    %86 = vector.load %arg14[%c8_29, %c0_30] : memref<64x256xf32, #tpu.memory_space<vmem>>, vector<8x256xf32>
    %87 = arith.addf %85, %86 : vector<8x256xf32>
    %88 = vector.extract_strided_slice %87 {offsets = [0, 0], sizes = [8, 192], strides = [1, 1]} : vector<8x256xf32> to vector<8x192xf32>
    %89 = arith.negf %88 : vector<8x192xf32>
    %90 = math.exp %89 : vector<8x192xf32>
    %cst_31 = arith.constant 1.000000e+00 : f32
    %91 = vector.broadcast %cst_31 : f32 to vector<8x192xf32>
    %92 = arith.addf %91, %90 : vector<8x192xf32>
    %93 = arith.divf %91, %92 : vector<8x192xf32>
    %94 = vector.extract_strided_slice %87 {offsets = [0, 192], sizes = [8, 64], strides = [1, 1]} : vector<8x256xf32> to vector<8x64xf32>
    %95 = math.tanh %94 : vector<8x64xf32>
    %96 = vector.extract_strided_slice %93 {offsets = [0, 0], sizes = [8, 64], strides = [1, 1]} : vector<8x192xf32> to vector<8x64xf32>
    %97 = vector.extract_strided_slice %93 {offsets = [0, 64], sizes = [8, 64], strides = [1, 1]} : vector<8x192xf32> to vector<8x64xf32>
    %98 = vector.extract_strided_slice %93 {offsets = [0, 128], sizes = [8, 64], strides = [1, 1]} : vector<8x192xf32> to vector<8x64xf32>
    %99 = arith.mulf %97, %78 : vector<8x64xf32>
    %100 = arith.mulf %96, %95 : vector<8x64xf32>
    %101 = arith.addf %99, %100 : vector<8x64xf32>
    %102 = math.tanh %101 : vector<8x64xf32>
    %103 = arith.mulf %98, %102 : vector<8x64xf32>
    %104 = vector.extract_strided_slice %103 {offsets = [0, 0], sizes = [8, 32], strides = [1, 1]} : vector<8x64xf32> to vector<8x32xf32>
    %c8_32 = arith.constant 8 : index
    %c0_33 = arith.constant 0 : index
    %105 = vector.load %arg15[%c8_32, %c0_33] : memref<64x64xf32, #tpu.memory_space<vmem>>, vector<8x32xf32>
    tpu.vector_store %arg15[%c8_32, %c0_33], %104 {strides = array<i32>} : memref<64x64xf32, #tpu.memory_space<vmem>>, vector<8x32xf32>,
    %106 = vector.extract_strided_slice %103 {offsets = [0, 32], sizes = [8, 32], strides = [1, 1]} : vector<8x64xf32> to vector<8x32xf32>
    %c48_34 = arith.constant 48 : index
    %c32_35 = arith.constant 32 : index
    %107 = vector.load %arg15[%c48_34, %c32_35] : memref<64x64xf32, #tpu.memory_space<vmem>>, vector<8x32xf32>
    tpu.vector_store %arg15[%c48_34, %c32_35], %106 {strides = array<i32>} : memref<64x64xf32, #tpu.memory_space<vmem>>, vector<8x32xf32>,
    %cst_36 = arith.constant dense<0.000000e+00> : vector<8x256xf32>
    %108 = tpu.matmul %103, %59, %cst_36 {dimension_numbers = #tpu.dot_dimension_numbers<[1], [0], [0], [1], [0, 0, 1, 1], [], []>} : vector<8x64xf32>, vector<64x256xf32>, vector<8x256xf32> -> vector<8x256xf32>
    %c16_37 = arith.constant 16 : index
    %c0_38 = arith.constant 0 : index
    %109 = vector.load %arg14[%c16_37, %c0_38] : memref<64x256xf32, #tpu.memory_space<vmem>>, vector<8x256xf32>
    %110 = arith.addf %108, %109 : vector<8x256xf32>
    %111 = vector.extract_strided_slice %110 {offsets = [0, 0], sizes = [8, 192], strides = [1, 1]} : vector<8x256xf32> to vector<8x192xf32>
    %112 = arith.negf %111 : vector<8x192xf32>
    %113 = math.exp %112 : vector<8x192xf32>
    %cst_39 = arith.constant 1.000000e+00 : f32
    %114 = vector.broadcast %cst_39 : f32 to vector<8x192xf32>
    %115 = arith.addf %114, %113 : vector<8x192xf32>
    %116 = arith.divf %114, %115 : vector<8x192xf32>
    %117 = vector.extract_strided_slice %110 {offsets = [0, 192], sizes = [8, 64], strides = [1, 1]} : vector<8x256xf32> to vector<8x64xf32>
    %118 = math.tanh %117 : vector<8x64xf32>
    %119 = vector.extract_strided_slice %116 {offsets = [0, 0], sizes = [8, 64], strides = [1, 1]} : vector<8x192xf32> to vector<8x64xf32>
    %120 = vector.extract_strided_slice %116 {offsets = [0, 64], sizes = [8, 64], strides = [1, 1]} : vector<8x192xf32> to vector<8x64xf32>
    %121 = vector.extract_strided_slice %116 {offsets = [0, 128], sizes = [8, 64], strides = [1, 1]} : vector<8x192xf32> to vector<8x64xf32>
    %122 = arith.mulf %120, %101 : vector<8x64xf32>
    %123 = arith.mulf %119, %118 : vector<8x64xf32>
    %124 = arith.addf %122, %123 : vector<8x64xf32>
    %125 = math.tanh %124 : vector<8x64xf32>
    %126 = arith.mulf %121, %125 : vector<8x64xf32>
    %127 = vector.extract_strided_slice %126 {offsets = [0, 0], sizes = [8, 32], strides = [1, 1]} : vector<8x64xf32> to vector<8x32xf32>
    %c16_40 = arith.constant 16 : index
    %c0_41 = arith.constant 0 : index
    %128 = vector.load %arg15[%c16_40, %c0_41] : memref<64x64xf32, #tpu.memory_space<vmem>>, vector<8x32xf32>
    tpu.vector_store %arg15[%c16_40, %c0_41], %127 {strides = array<i32>} : memref<64x64xf32, #tpu.memory_space<vmem>>, vector<8x32xf32>,
    %129 = vector.extract_strided_slice %126 {offsets = [0, 32], sizes = [8, 32], strides = [1, 1]} : vector<8x64xf32> to vector<8x32xf32>
    %c40_42 = arith.constant 40 : index
    %c32_43 = arith.constant 32 : index
    %130 = vector.load %arg15[%c40_42, %c32_43] : memref<64x64xf32, #tpu.memory_space<vmem>>, vector<8x32xf32>
    tpu.vector_store %arg15[%c40_42, %c32_43], %129 {strides = array<i32>} : memref<64x64xf32, #tpu.memory_space<vmem>>, vector<8x32xf32>,
    %cst_44 = arith.constant dense<0.000000e+00> : vector<8x256xf32>
    %131 = tpu.matmul %126, %59, %cst_44 {dimension_numbers = #tpu.dot_dimension_numbers<[1], [0], [0], [1], [0, 0, 1, 1], [], []>} : vector<8x64xf32>, vector<64x256xf32>, vector<8x256xf32> -> vector<8x256xf32>
    %c24_45 = arith.constant 24 : index
    %c0_46 = arith.constant 0 : index
    %132 = vector.load %arg14[%c24_45, %c0_46] : memref<64x256xf32, #tpu.memory_space<vmem>>, vector<8x256xf32>
    %133 = arith.addf %131, %132 : vector<8x256xf32>
    %134 = vector.extract_strided_slice %133 {offsets = [0, 0], sizes = [8, 192], strides = [1, 1]} : vector<8x256xf32> to vector<8x192xf32>
    %135 = arith.negf %134 : vector<8x192xf32>
    %136 = math.exp %135 : vector<8x192xf32>
    %cst_47 = arith.constant 1.000000e+00 : f32
    %137 = vector.broadcast %cst_47 : f32 to vector<8x192xf32>
    %138 = arith.addf %137, %136 : vector<8x192xf32>
    %139 = arith.divf %137, %138 : vector<8x192xf32>
    %140 = vector.extract_strided_slice %133 {offsets = [0, 192], sizes = [8, 64], strides = [1, 1]} : vector<8x256xf32> to vector<8x64xf32>
    %141 = math.tanh %140 : vector<8x64xf32>
    %142 = vector.extract_strided_slice %139 {offsets = [0, 0], sizes = [8, 64], strides = [1, 1]} : vector<8x192xf32> to vector<8x64xf32>
    %143 = vector.extract_strided_slice %139 {offsets = [0, 64], sizes = [8, 64], strides = [1, 1]} : vector<8x192xf32> to vector<8x64xf32>
    %144 = vector.extract_strided_slice %139 {offsets = [0, 128], sizes = [8, 64], strides = [1, 1]} : vector<8x192xf32> to vector<8x64xf32>
    %145 = arith.mulf %143, %124 : vector<8x64xf32>
    %146 = arith.mulf %142, %141 : vector<8x64xf32>
    %147 = arith.addf %145, %146 : vector<8x64xf32>
    %148 = math.tanh %147 : vector<8x64xf32>
    %149 = arith.mulf %144, %148 : vector<8x64xf32>
    %150 = vector.extract_strided_slice %149 {offsets = [0, 0], sizes = [8, 32], strides = [1, 1]} : vector<8x64xf32> to vector<8x32xf32>
    %c24_48 = arith.constant 24 : index
    %c0_49 = arith.constant 0 : index
    %151 = vector.load %arg15[%c24_48, %c0_49] : memref<64x64xf32, #tpu.memory_space<vmem>>, vector<8x32xf32>
    tpu.vector_store %arg15[%c24_48, %c0_49], %150 {strides = array<i32>} : memref<64x64xf32, #tpu.memory_space<vmem>>, vector<8x32xf32>,
    %152 = vector.extract_strided_slice %149 {offsets = [0, 32], sizes = [8, 32], strides = [1, 1]} : vector<8x64xf32> to vector<8x32xf32>
    %c32_50 = arith.constant 32 : index
    %c32_51 = arith.constant 32 : index
    %153 = vector.load %arg15[%c32_50, %c32_51] : memref<64x64xf32, #tpu.memory_space<vmem>>, vector<8x32xf32>
    tpu.vector_store %arg15[%c32_50, %c32_51], %152 {strides = array<i32>} : memref<64x64xf32, #tpu.memory_space<vmem>>, vector<8x32xf32>,
    %cst_52 = arith.constant dense<0.000000e+00> : vector<8x256xf32>
    %154 = tpu.matmul %149, %59, %cst_52 {dimension_numbers = #tpu.dot_dimension_numbers<[1], [0], [0], [1], [0, 0, 1, 1], [], []>} : vector<8x64xf32>, vector<64x256xf32>, vector<8x256xf32> -> vector<8x256xf32>
    %c32_53 = arith.constant 32 : index
    %c0_54 = arith.constant 0 : index
    %155 = vector.load %arg14[%c32_53, %c0_54] : memref<64x256xf32, #tpu.memory_space<vmem>>, vector<8x256xf32>
    %156 = arith.addf %154, %155 : vector<8x256xf32>
    %157 = vector.extract_strided_slice %156 {offsets = [0, 0], sizes = [8, 192], strides = [1, 1]} : vector<8x256xf32> to vector<8x192xf32>
    %158 = arith.negf %157 : vector<8x192xf32>
    %159 = math.exp %158 : vector<8x192xf32>
    %cst_55 = arith.constant 1.000000e+00 : f32
    %160 = vector.broadcast %cst_55 : f32 to vector<8x192xf32>
    %161 = arith.addf %160, %159 : vector<8x192xf32>
    %162 = arith.divf %160, %161 : vector<8x192xf32>
    %163 = vector.extract_strided_slice %156 {offsets = [0, 192], sizes = [8, 64], strides = [1, 1]} : vector<8x256xf32> to vector<8x64xf32>
    %164 = math.tanh %163 : vector<8x64xf32>
    %165 = vector.extract_strided_slice %162 {offsets = [0, 0], sizes = [8, 64], strides = [1, 1]} : vector<8x192xf32> to vector<8x64xf32>
    %166 = vector.extract_strided_slice %162 {offsets = [0, 64], sizes = [8, 64], strides = [1, 1]} : vector<8x192xf32> to vector<8x64xf32>
    %167 = vector.extract_strided_slice %162 {offsets = [0, 128], sizes = [8, 64], strides = [1, 1]} : vector<8x192xf32> to vector<8x64xf32>
    %168 = arith.mulf %166, %147 : vector<8x64xf32>
    %169 = arith.mulf %165, %164 : vector<8x64xf32>
    %170 = arith.addf %168, %169 : vector<8x64xf32>
    %171 = math.tanh %170 : vector<8x64xf32>
    %172 = arith.mulf %167, %171 : vector<8x64xf32>
    %173 = vector.extract_strided_slice %172 {offsets = [0, 0], sizes = [8, 32], strides = [1, 1]} : vector<8x64xf32> to vector<8x32xf32>
    %c32_56 = arith.constant 32 : index
    %c0_57 = arith.constant 0 : index
    %174 = vector.load %arg15[%c32_56, %c0_57] : memref<64x64xf32, #tpu.memory_space<vmem>>, vector<8x32xf32>
    tpu.vector_store %arg15[%c32_56, %c0_57], %173 {strides = array<i32>} : memref<64x64xf32, #tpu.memory_space<vmem>>, vector<8x32xf32>,
    %175 = vector.extract_strided_slice %172 {offsets = [0, 32], sizes = [8, 32], strides = [1, 1]} : vector<8x64xf32> to vector<8x32xf32>
    %c24_58 = arith.constant 24 : index
    %c32_59 = arith.constant 32 : index
    %176 = vector.load %arg15[%c24_58, %c32_59] : memref<64x64xf32, #tpu.memory_space<vmem>>, vector<8x32xf32>
    tpu.vector_store %arg15[%c24_58, %c32_59], %175 {strides = array<i32>} : memref<64x64xf32, #tpu.memory_space<vmem>>, vector<8x32xf32>,
    %cst_60 = arith.constant dense<0.000000e+00> : vector<8x256xf32>
    %177 = tpu.matmul %172, %59, %cst_60 {dimension_numbers = #tpu.dot_dimension_numbers<[1], [0], [0], [1], [0, 0, 1, 1], [], []>} : vector<8x64xf32>, vector<64x256xf32>, vector<8x256xf32> -> vector<8x256xf32>
    %c40_61 = arith.constant 40 : index
    %c0_62 = arith.constant 0 : index
    %178 = vector.load %arg14[%c40_61, %c0_62] : memref<64x256xf32, #tpu.memory_space<vmem>>, vector<8x256xf32>
    %179 = arith.addf %177, %178 : vector<8x256xf32>
    %180 = vector.extract_strided_slice %179 {offsets = [0, 0], sizes = [8, 192], strides = [1, 1]} : vector<8x256xf32> to vector<8x192xf32>
    %181 = arith.negf %180 : vector<8x192xf32>
    %182 = math.exp %181 : vector<8x192xf32>
    %cst_63 = arith.constant 1.000000e+00 : f32
    %183 = vector.broadcast %cst_63 : f32 to vector<8x192xf32>
    %184 = arith.addf %183, %182 : vector<8x192xf32>
    %185 = arith.divf %183, %184 : vector<8x192xf32>
    %186 = vector.extract_strided_slice %179 {offsets = [0, 192], sizes = [8, 64], strides = [1, 1]} : vector<8x256xf32> to vector<8x64xf32>
    %187 = math.tanh %186 : vector<8x64xf32>
    %188 = vector.extract_strided_slice %185 {offsets = [0, 0], sizes = [8, 64], strides = [1, 1]} : vector<8x192xf32> to vector<8x64xf32>
    %189 = vector.extract_strided_slice %185 {offsets = [0, 64], sizes = [8, 64], strides = [1, 1]} : vector<8x192xf32> to vector<8x64xf32>
    %190 = vector.extract_strided_slice %185 {offsets = [0, 128], sizes = [8, 64], strides = [1, 1]} : vector<8x192xf32> to vector<8x64xf32>
    %191 = arith.mulf %189, %170 : vector<8x64xf32>
    %192 = arith.mulf %188, %187 : vector<8x64xf32>
    %193 = arith.addf %191, %192 : vector<8x64xf32>
    %194 = math.tanh %193 : vector<8x64xf32>
    %195 = arith.mulf %190, %194 : vector<8x64xf32>
    %196 = vector.extract_strided_slice %195 {offsets = [0, 0], sizes = [8, 32], strides = [1, 1]} : vector<8x64xf32> to vector<8x32xf32>
    %c40_64 = arith.constant 40 : index
    %c0_65 = arith.constant 0 : index
    %197 = vector.load %arg15[%c40_64, %c0_65] : memref<64x64xf32, #tpu.memory_space<vmem>>, vector<8x32xf32>
    tpu.vector_store %arg15[%c40_64, %c0_65], %196 {strides = array<i32>} : memref<64x64xf32, #tpu.memory_space<vmem>>, vector<8x32xf32>,
    %198 = vector.extract_strided_slice %195 {offsets = [0, 32], sizes = [8, 32], strides = [1, 1]} : vector<8x64xf32> to vector<8x32xf32>
    %c16_66 = arith.constant 16 : index
    %c32_67 = arith.constant 32 : index
    %199 = vector.load %arg15[%c16_66, %c32_67] : memref<64x64xf32, #tpu.memory_space<vmem>>, vector<8x32xf32>
    tpu.vector_store %arg15[%c16_66, %c32_67], %198 {strides = array<i32>} : memref<64x64xf32, #tpu.memory_space<vmem>>, vector<8x32xf32>,
    %cst_68 = arith.constant dense<0.000000e+00> : vector<8x256xf32>
    %200 = tpu.matmul %195, %59, %cst_68 {dimension_numbers = #tpu.dot_dimension_numbers<[1], [0], [0], [1], [0, 0, 1, 1], [], []>} : vector<8x64xf32>, vector<64x256xf32>, vector<8x256xf32> -> vector<8x256xf32>
    %c48_69 = arith.constant 48 : index
    %c0_70 = arith.constant 0 : index
    %201 = vector.load %arg14[%c48_69, %c0_70] : memref<64x256xf32, #tpu.memory_space<vmem>>, vector<8x256xf32>
    %202 = arith.addf %200, %201 : vector<8x256xf32>
    %203 = vector.extract_strided_slice %202 {offsets = [0, 0], sizes = [8, 192], strides = [1, 1]} : vector<8x256xf32> to vector<8x192xf32>
    %204 = arith.negf %203 : vector<8x192xf32>
    %205 = math.exp %204 : vector<8x192xf32>
    %cst_71 = arith.constant 1.000000e+00 : f32
    %206 = vector.broadcast %cst_71 : f32 to vector<8x192xf32>
    %207 = arith.addf %206, %205 : vector<8x192xf32>
    %208 = arith.divf %206, %207 : vector<8x192xf32>
    %209 = vector.extract_strided_slice %202 {offsets = [0, 192], sizes = [8, 64], strides = [1, 1]} : vector<8x256xf32> to vector<8x64xf32>
    %210 = math.tanh %209 : vector<8x64xf32>
    %211 = vector.extract_strided_slice %208 {offsets = [0, 0], sizes = [8, 64], strides = [1, 1]} : vector<8x192xf32> to vector<8x64xf32>
    %212 = vector.extract_strided_slice %208 {offsets = [0, 64], sizes = [8, 64], strides = [1, 1]} : vector<8x192xf32> to vector<8x64xf32>
    %213 = vector.extract_strided_slice %208 {offsets = [0, 128], sizes = [8, 64], strides = [1, 1]} : vector<8x192xf32> to vector<8x64xf32>
    %214 = arith.mulf %212, %193 : vector<8x64xf32>
    %215 = arith.mulf %211, %210 : vector<8x64xf32>
    %216 = arith.addf %214, %215 : vector<8x64xf32>
    %217 = math.tanh %216 : vector<8x64xf32>
    %218 = arith.mulf %213, %217 : vector<8x64xf32>
    %219 = vector.extract_strided_slice %218 {offsets = [0, 0], sizes = [8, 32], strides = [1, 1]} : vector<8x64xf32> to vector<8x32xf32>
    %c48_72 = arith.constant 48 : index
    %c0_73 = arith.constant 0 : index
    %220 = vector.load %arg15[%c48_72, %c0_73] : memref<64x64xf32, #tpu.memory_space<vmem>>, vector<8x32xf32>
    tpu.vector_store %arg15[%c48_72, %c0_73], %219 {strides = array<i32>} : memref<64x64xf32, #tpu.memory_space<vmem>>, vector<8x32xf32>,
    %221 = vector.extract_strided_slice %218 {offsets = [0, 32], sizes = [8, 32], strides = [1, 1]} : vector<8x64xf32> to vector<8x32xf32>
    %c8_74 = arith.constant 8 : index
    %c32_75 = arith.constant 32 : index
    %222 = vector.load %arg15[%c8_74, %c32_75] : memref<64x64xf32, #tpu.memory_space<vmem>>, vector<8x32xf32>
    tpu.vector_store %arg15[%c8_74, %c32_75], %221 {strides = array<i32>} : memref<64x64xf32, #tpu.memory_space<vmem>>, vector<8x32xf32>,
    %cst_76 = arith.constant dense<0.000000e+00> : vector<8x256xf32>
    %223 = tpu.matmul %218, %59, %cst_76 {dimension_numbers = #tpu.dot_dimension_numbers<[1], [0], [0], [1], [0, 0, 1, 1], [], []>} : vector<8x64xf32>, vector<64x256xf32>, vector<8x256xf32> -> vector<8x256xf32>
    %c56_77 = arith.constant 56 : index
    %c0_78 = arith.constant 0 : index
    %224 = vector.load %arg14[%c56_77, %c0_78] : memref<64x256xf32, #tpu.memory_space<vmem>>, vector<8x256xf32>
    %225 = arith.addf %223, %224 : vector<8x256xf32>
    %226 = vector.extract_strided_slice %225 {offsets = [0, 0], sizes = [8, 192], strides = [1, 1]} : vector<8x256xf32> to vector<8x192xf32>
    %227 = arith.negf %226 : vector<8x192xf32>
    %228 = math.exp %227 : vector<8x192xf32>
    %cst_79 = arith.constant 1.000000e+00 : f32
    %229 = vector.broadcast %cst_79 : f32 to vector<8x192xf32>
    %230 = arith.addf %229, %228 : vector<8x192xf32>
    %231 = arith.divf %229, %230 : vector<8x192xf32>
    %232 = vector.extract_strided_slice %225 {offsets = [0, 192], sizes = [8, 64], strides = [1, 1]} : vector<8x256xf32> to vector<8x64xf32>
    %233 = math.tanh %232 : vector<8x64xf32>
    %234 = vector.extract_strided_slice %231 {offsets = [0, 0], sizes = [8, 64], strides = [1, 1]} : vector<8x192xf32> to vector<8x64xf32>
    %235 = vector.extract_strided_slice %231 {offsets = [0, 64], sizes = [8, 64], strides = [1, 1]} : vector<8x192xf32> to vector<8x64xf32>
    %236 = vector.extract_strided_slice %231 {offsets = [0, 128], sizes = [8, 64], strides = [1, 1]} : vector<8x192xf32> to vector<8x64xf32>
    %237 = arith.mulf %235, %216 : vector<8x64xf32>
    %238 = arith.mulf %234, %233 : vector<8x64xf32>
    %239 = arith.addf %237, %238 : vector<8x64xf32>
    %240 = math.tanh %239 : vector<8x64xf32>
    %241 = arith.mulf %236, %240 : vector<8x64xf32>
    %242 = vector.extract_strided_slice %241 {offsets = [0, 0], sizes = [8, 32], strides = [1, 1]} : vector<8x64xf32> to vector<8x32xf32>
    %c56_80 = arith.constant 56 : index
    %c0_81 = arith.constant 0 : index
    %243 = vector.load %arg15[%c56_80, %c0_81] : memref<64x64xf32, #tpu.memory_space<vmem>>, vector<8x32xf32>
    tpu.vector_store %arg15[%c56_80, %c0_81], %242 {strides = array<i32>} : memref<64x64xf32, #tpu.memory_space<vmem>>, vector<8x32xf32>,
    %244 = vector.extract_strided_slice %241 {offsets = [0, 32], sizes = [8, 32], strides = [1, 1]} : vector<8x64xf32> to vector<8x32xf32>
    %c0_82 = arith.constant 0 : index
    %c32_83 = arith.constant 32 : index
    %245 = vector.load %arg15[%c0_82, %c32_83] : memref<64x64xf32, #tpu.memory_space<vmem>>, vector<8x32xf32>
    tpu.vector_store %arg15[%c0_82, %c32_83], %244 {strides = array<i32>} : memref<64x64xf32, #tpu.memory_space<vmem>>, vector<8x32xf32>,
    %c0_84 = arith.constant 0 : index
    %c0_85 = arith.constant 0 : index
    %246 = vector.load %arg15[%c0_84, %c0_85] : memref<64x64xf32, #tpu.memory_space<vmem>>, vector<64x64xf32>
    %c0_86 = arith.constant 0 : index
    %c0_87 = arith.constant 0 : index
    %247 = vector.load %arg6[%c0_86, %c0_87] : memref<64x256xf32, #tpu.memory_space<vmem>>, vector<64x256xf32>
    %cst_88 = arith.constant dense<0.000000e+00> : vector<64x256xf32>
    %248 = tpu.matmul %246, %247, %cst_88 {dimension_numbers = #tpu.dot_dimension_numbers<[1], [0], [0], [1], [0, 0, 1, 1], [], []>} : vector<64x64xf32>, vector<64x256xf32>, vector<64x256xf32> -> vector<64x256xf32>
    %c0_89 = arith.constant 0 : index
    %c0_90 = arith.constant 0 : index
    %249 = vector.load %arg7[%c0_89, %c0_90] : memref<1x256xf32, #tpu.memory_space<vmem>>, vector<1x256xf32>
    %250 = vector.broadcast %249 : vector<1x256xf32> to vector<64x256xf32>
    %251 = arith.addf %248, %250 : vector<64x256xf32>
    %252 = vector.extract_strided_slice %251 {offsets = [0, 0], sizes = [8, 256], strides = [1, 1]} : vector<64x256xf32> to vector<8x256xf32>
    %253 = vector.extract_strided_slice %251 {offsets = [56, 0], sizes = [8, 256], strides = [1, 1]} : vector<64x256xf32> to vector<8x256xf32>
    %254 = vector.shape_cast %4 : vector<1x256xi1> to vector<1x256xi1>
    %255 = vector.broadcast %254 : vector<1x256xi1> to vector<8x256xi1>
    %256 = arith.select %255, %252, %253 : vector<8x256xi1>, vector<8x256xf32>
    %c0_91 = arith.constant 0 : index
    %c0_92 = arith.constant 0 : index
    %257 = vector.load %arg14[%c0_91, %c0_92] : memref<64x256xf32, #tpu.memory_space<vmem>>, vector<8x256xf32>
    tpu.vector_store %arg14[%c0_91, %c0_92], %256 {strides = array<i32>} : memref<64x256xf32, #tpu.memory_space<vmem>>, vector<8x256xf32>,
    %258 = vector.extract_strided_slice %251 {offsets = [8, 0], sizes = [8, 256], strides = [1, 1]} : vector<64x256xf32> to vector<8x256xf32>
    %259 = vector.extract_strided_slice %251 {offsets = [48, 0], sizes = [8, 256], strides = [1, 1]} : vector<64x256xf32> to vector<8x256xf32>
    %260 = vector.shape_cast %4 : vector<1x256xi1> to vector<1x256xi1>
    %261 = vector.broadcast %260 : vector<1x256xi1> to vector<8x256xi1>
    %262 = arith.select %261, %258, %259 : vector<8x256xi1>, vector<8x256xf32>
    %c8_93 = arith.constant 8 : index
    %c0_94 = arith.constant 0 : index
    %263 = vector.load %arg14[%c8_93, %c0_94] : memref<64x256xf32, #tpu.memory_space<vmem>>, vector<8x256xf32>
    tpu.vector_store %arg14[%c8_93, %c0_94], %262 {strides = array<i32>} : memref<64x256xf32, #tpu.memory_space<vmem>>, vector<8x256xf32>,
    %264 = vector.extract_strided_slice %251 {offsets = [16, 0], sizes = [8, 256], strides = [1, 1]} : vector<64x256xf32> to vector<8x256xf32>
    %265 = vector.extract_strided_slice %251 {offsets = [40, 0], sizes = [8, 256], strides = [1, 1]} : vector<64x256xf32> to vector<8x256xf32>
    %266 = vector.shape_cast %4 : vector<1x256xi1> to vector<1x256xi1>
    %267 = vector.broadcast %266 : vector<1x256xi1> to vector<8x256xi1>
    %268 = arith.select %267, %264, %265 : vector<8x256xi1>, vector<8x256xf32>
    %c16_95 = arith.constant 16 : index
    %c0_96 = arith.constant 0 : index
    %269 = vector.load %arg14[%c16_95, %c0_96] : memref<64x256xf32, #tpu.memory_space<vmem>>, vector<8x256xf32>
    tpu.vector_store %arg14[%c16_95, %c0_96], %268 {strides = array<i32>} : memref<64x256xf32, #tpu.memory_space<vmem>>, vector<8x256xf32>,
    %270 = vector.extract_strided_slice %251 {offsets = [24, 0], sizes = [8, 256], strides = [1, 1]} : vector<64x256xf32> to vector<8x256xf32>
    %271 = vector.extract_strided_slice %251 {offsets = [32, 0], sizes = [8, 256], strides = [1, 1]} : vector<64x256xf32> to vector<8x256xf32>
    %272 = vector.shape_cast %4 : vector<1x256xi1> to vector<1x256xi1>
    %273 = vector.broadcast %272 : vector<1x256xi1> to vector<8x256xi1>
    %274 = arith.select %273, %270, %271 : vector<8x256xi1>, vector<8x256xf32>
    %c24_97 = arith.constant 24 : index
    %c0_98 = arith.constant 0 : index
    %275 = vector.load %arg14[%c24_97, %c0_98] : memref<64x256xf32, #tpu.memory_space<vmem>>, vector<8x256xf32>
    tpu.vector_store %arg14[%c24_97, %c0_98], %274 {strides = array<i32>} : memref<64x256xf32, #tpu.memory_space<vmem>>, vector<8x256xf32>,
    %276 = vector.extract_strided_slice %251 {offsets = [32, 0], sizes = [8, 256], strides = [1, 1]} : vector<64x256xf32> to vector<8x256xf32>
    %277 = vector.extract_strided_slice %251 {offsets = [24, 0], sizes = [8, 256], strides = [1, 1]} : vector<64x256xf32> to vector<8x256xf32>
    %278 = vector.shape_cast %4 : vector<1x256xi1> to vector<1x256xi1>
    %279 = vector.broadcast %278 : vector<1x256xi1> to vector<8x256xi1>
    %280 = arith.select %279, %276, %277 : vector<8x256xi1>, vector<8x256xf32>
    %c32_99 = arith.constant 32 : index
    %c0_100 = arith.constant 0 : index
    %281 = vector.load %arg14[%c32_99, %c0_100] : memref<64x256xf32, #tpu.memory_space<vmem>>, vector<8x256xf32>
    tpu.vector_store %arg14[%c32_99, %c0_100], %280 {strides = array<i32>} : memref<64x256xf32, #tpu.memory_space<vmem>>, vector<8x256xf32>,
    %282 = vector.extract_strided_slice %251 {offsets = [40, 0], sizes = [8, 256], strides = [1, 1]} : vector<64x256xf32> to vector<8x256xf32>
    %283 = vector.extract_strided_slice %251 {offsets = [16, 0], sizes = [8, 256], strides = [1, 1]} : vector<64x256xf32> to vector<8x256xf32>
    %284 = vector.shape_cast %4 : vector<1x256xi1> to vector<1x256xi1>
    %285 = vector.broadcast %284 : vector<1x256xi1> to vector<8x256xi1>
    %286 = arith.select %285, %282, %283 : vector<8x256xi1>, vector<8x256xf32>
    %c40_101 = arith.constant 40 : index
    %c0_102 = arith.constant 0 : index
    %287 = vector.load %arg14[%c40_101, %c0_102] : memref<64x256xf32, #tpu.memory_space<vmem>>, vector<8x256xf32>
    tpu.vector_store %arg14[%c40_101, %c0_102], %286 {strides = array<i32>} : memref<64x256xf32, #tpu.memory_space<vmem>>, vector<8x256xf32>,
    %288 = vector.extract_strided_slice %251 {offsets = [48, 0], sizes = [8, 256], strides = [1, 1]} : vector<64x256xf32> to vector<8x256xf32>
    %289 = vector.extract_strided_slice %251 {offsets = [8, 0], sizes = [8, 256], strides = [1, 1]} : vector<64x256xf32> to vector<8x256xf32>
    %290 = vector.shape_cast %4 : vector<1x256xi1> to vector<1x256xi1>
    %291 = vector.broadcast %290 : vector<1x256xi1> to vector<8x256xi1>
    %292 = arith.select %291, %288, %289 : vector<8x256xi1>, vector<8x256xf32>
    %c48_103 = arith.constant 48 : index
    %c0_104 = arith.constant 0 : index
    %293 = vector.load %arg14[%c48_103, %c0_104] : memref<64x256xf32, #tpu.memory_space<vmem>>, vector<8x256xf32>
    tpu.vector_store %arg14[%c48_103, %c0_104], %292 {strides = array<i32>} : memref<64x256xf32, #tpu.memory_space<vmem>>, vector<8x256xf32>,
    %294 = vector.extract_strided_slice %251 {offsets = [56, 0], sizes = [8, 256], strides = [1, 1]} : vector<64x256xf32> to vector<8x256xf32>
    %295 = vector.extract_strided_slice %251 {offsets = [0, 0], sizes = [8, 256], strides = [1, 1]} : vector<64x256xf32> to vector<8x256xf32>
    %296 = vector.shape_cast %4 : vector<1x256xi1> to vector<1x256xi1>
    %297 = vector.broadcast %296 : vector<1x256xi1> to vector<8x256xi1>
    %298 = arith.select %297, %294, %295 : vector<8x256xi1>, vector<8x256xf32>
    %c56_105 = arith.constant 56 : index
    %c0_106 = arith.constant 0 : index
    %299 = vector.load %arg14[%c56_105, %c0_106] : memref<64x256xf32, #tpu.memory_space<vmem>>, vector<8x256xf32>
    tpu.vector_store %arg14[%c56_105, %c0_106], %298 {strides = array<i32>} : memref<64x256xf32, #tpu.memory_space<vmem>>, vector<8x256xf32>,
    %c0_107 = arith.constant 0 : index
    %c0_108 = arith.constant 0 : index
    %300 = vector.load %arg8[%c0_107, %c0_108] : memref<64x256xf32, #tpu.memory_space<vmem>>, vector<64x256xf32>
    %c0_109 = arith.constant 0 : index
    %c0_110 = arith.constant 0 : index
    %301 = vector.load %arg9[%c0_109, %c0_110] : memref<8x64xf32, #tpu.memory_space<vmem>>, vector<8x64xf32>
    %c0_111 = arith.constant 0 : index
    %c0_112 = arith.constant 0 : index
    %302 = vector.load %arg10[%c0_111, %c0_112] : memref<8x64xf32, #tpu.memory_space<vmem>>, vector<8x64xf32>
    %cst_113 = arith.constant dense<0.000000e+00> : vector<8x256xf32>
    %303 = tpu.matmul %301, %300, %cst_113 {dimension_numbers = #tpu.dot_dimension_numbers<[1], [0], [0], [1], [0, 0, 1, 1], [], []>} : vector<8x64xf32>, vector<64x256xf32>, vector<8x256xf32> -> vector<8x256xf32>
    %c0_114 = arith.constant 0 : index
    %c0_115 = arith.constant 0 : index
    %304 = vector.load %arg14[%c0_114, %c0_115] : memref<64x256xf32, #tpu.memory_space<vmem>>, vector<8x256xf32>
    %305 = arith.addf %303, %304 : vector<8x256xf32>
    %306 = vector.extract_strided_slice %305 {offsets = [0, 0], sizes = [8, 192], strides = [1, 1]} : vector<8x256xf32> to vector<8x192xf32>
    %307 = arith.negf %306 : vector<8x192xf32>
    %308 = math.exp %307 : vector<8x192xf32>
    %cst_116 = arith.constant 1.000000e+00 : f32
    %309 = vector.broadcast %cst_116 : f32 to vector<8x192xf32>
    %310 = arith.addf %309, %308 : vector<8x192xf32>
    %311 = arith.divf %309, %310 : vector<8x192xf32>
    %312 = vector.extract_strided_slice %305 {offsets = [0, 192], sizes = [8, 64], strides = [1, 1]} : vector<8x256xf32> to vector<8x64xf32>
    %313 = math.tanh %312 : vector<8x64xf32>
    %314 = vector.extract_strided_slice %311 {offsets = [0, 0], sizes = [8, 64], strides = [1, 1]} : vector<8x192xf32> to vector<8x64xf32>
    %315 = vector.extract_strided_slice %311 {offsets = [0, 64], sizes = [8, 64], strides = [1, 1]} : vector<8x192xf32> to vector<8x64xf32>
    %316 = vector.extract_strided_slice %311 {offsets = [0, 128], sizes = [8, 64], strides = [1, 1]} : vector<8x192xf32> to vector<8x64xf32>
    %317 = arith.mulf %315, %302 : vector<8x64xf32>
    %318 = arith.mulf %314, %313 : vector<8x64xf32>
    %319 = arith.addf %317, %318 : vector<8x64xf32>
    %320 = math.tanh %319 : vector<8x64xf32>
    %321 = arith.mulf %316, %320 : vector<8x64xf32>
    %322 = vector.extract_strided_slice %321 {offsets = [0, 32], sizes = [8, 32], strides = [1, 1]} : vector<8x64xf32> to vector<8x32xf32>
    %cst_117 = arith.constant dense<0.000000e+00> : vector<8x256xf32>
    %323 = tpu.matmul %321, %300, %cst_117 {dimension_numbers = #tpu.dot_dimension_numbers<[1], [0], [0], [1], [0, 0, 1, 1], [], []>} : vector<8x64xf32>, vector<64x256xf32>, vector<8x256xf32> -> vector<8x256xf32>
    %c8_118 = arith.constant 8 : index
    %c0_119 = arith.constant 0 : index
    %324 = vector.load %arg14[%c8_118, %c0_119] : memref<64x256xf32, #tpu.memory_space<vmem>>, vector<8x256xf32>
    %325 = arith.addf %323, %324 : vector<8x256xf32>
    %326 = vector.extract_strided_slice %325 {offsets = [0, 0], sizes = [8, 192], strides = [1, 1]} : vector<8x256xf32> to vector<8x192xf32>
    %327 = arith.negf %326 : vector<8x192xf32>
    %328 = math.exp %327 : vector<8x192xf32>
    %cst_120 = arith.constant 1.000000e+00 : f32
    %329 = vector.broadcast %cst_120 : f32 to vector<8x192xf32>
    %330 = arith.addf %329, %328 : vector<8x192xf32>
    %331 = arith.divf %329, %330 : vector<8x192xf32>
    %332 = vector.extract_strided_slice %325 {offsets = [0, 192], sizes = [8, 64], strides = [1, 1]} : vector<8x256xf32> to vector<8x64xf32>
    %333 = math.tanh %332 : vector<8x64xf32>
    %334 = vector.extract_strided_slice %331 {offsets = [0, 0], sizes = [8, 64], strides = [1, 1]} : vector<8x192xf32> to vector<8x64xf32>
    %335 = vector.extract_strided_slice %331 {offsets = [0, 64], sizes = [8, 64], strides = [1, 1]} : vector<8x192xf32> to vector<8x64xf32>
    %336 = vector.extract_strided_slice %331 {offsets = [0, 128], sizes = [8, 64], strides = [1, 1]} : vector<8x192xf32> to vector<8x64xf32>
    %337 = arith.mulf %335, %319 : vector<8x64xf32>
    %338 = arith.mulf %334, %333 : vector<8x64xf32>
    %339 = arith.addf %337, %338 : vector<8x64xf32>
    %340 = math.tanh %339 : vector<8x64xf32>
    %341 = arith.mulf %336, %340 : vector<8x64xf32>
    %cst_121 = arith.constant dense<0.000000e+00> : vector<8x256xf32>
    %342 = tpu.matmul %341, %300, %cst_121 {dimension_numbers = #tpu.dot_dimension_numbers<[1], [0], [0], [1], [0, 0, 1, 1], [], []>} : vector<8x64xf32>, vector<64x256xf32>, vector<8x256xf32> -> vector<8x256xf32>
    %c16_122 = arith.constant 16 : index
    %c0_123 = arith.constant 0 : index
    %343 = vector.load %arg14[%c16_122, %c0_123] : memref<64x256xf32, #tpu.memory_space<vmem>>, vector<8x256xf32>
    %344 = arith.addf %342, %343 : vector<8x256xf32>
    %345 = vector.extract_strided_slice %344 {offsets = [0, 0], sizes = [8, 192], strides = [1, 1]} : vector<8x256xf32> to vector<8x192xf32>
    %346 = arith.negf %345 : vector<8x192xf32>
    %347 = math.exp %346 : vector<8x192xf32>
    %cst_124 = arith.constant 1.000000e+00 : f32
    %348 = vector.broadcast %cst_124 : f32 to vector<8x192xf32>
    %349 = arith.addf %348, %347 : vector<8x192xf32>
    %350 = arith.divf %348, %349 : vector<8x192xf32>
    %351 = vector.extract_strided_slice %344 {offsets = [0, 192], sizes = [8, 64], strides = [1, 1]} : vector<8x256xf32> to vector<8x64xf32>
    %352 = math.tanh %351 : vector<8x64xf32>
    %353 = vector.extract_strided_slice %350 {offsets = [0, 0], sizes = [8, 64], strides = [1, 1]} : vector<8x192xf32> to vector<8x64xf32>
    %354 = vector.extract_strided_slice %350 {offsets = [0, 64], sizes = [8, 64], strides = [1, 1]} : vector<8x192xf32> to vector<8x64xf32>
    %355 = vector.extract_strided_slice %350 {offsets = [0, 128], sizes = [8, 64], strides = [1, 1]} : vector<8x192xf32> to vector<8x64xf32>
    %356 = arith.mulf %354, %339 : vector<8x64xf32>
    %357 = arith.mulf %353, %352 : vector<8x64xf32>
    %358 = arith.addf %356, %357 : vector<8x64xf32>
    %359 = math.tanh %358 : vector<8x64xf32>
    %360 = arith.mulf %355, %359 : vector<8x64xf32>
    %cst_125 = arith.constant dense<0.000000e+00> : vector<8x256xf32>
    %361 = tpu.matmul %360, %300, %cst_125 {dimension_numbers = #tpu.dot_dimension_numbers<[1], [0], [0], [1], [0, 0, 1, 1], [], []>} : vector<8x64xf32>, vector<64x256xf32>, vector<8x256xf32> -> vector<8x256xf32>
    %c24_126 = arith.constant 24 : index
    %c0_127 = arith.constant 0 : index
    %362 = vector.load %arg14[%c24_126, %c0_127] : memref<64x256xf32, #tpu.memory_space<vmem>>, vector<8x256xf32>
    %363 = arith.addf %361, %362 : vector<8x256xf32>
    %364 = vector.extract_strided_slice %363 {offsets = [0, 0], sizes = [8, 192], strides = [1, 1]} : vector<8x256xf32> to vector<8x192xf32>
    %365 = arith.negf %364 : vector<8x192xf32>
    %366 = math.exp %365 : vector<8x192xf32>
    %cst_128 = arith.constant 1.000000e+00 : f32
    %367 = vector.broadcast %cst_128 : f32 to vector<8x192xf32>
    %368 = arith.addf %367, %366 : vector<8x192xf32>
    %369 = arith.divf %367, %368 : vector<8x192xf32>
    %370 = vector.extract_strided_slice %363 {offsets = [0, 192], sizes = [8, 64], strides = [1, 1]} : vector<8x256xf32> to vector<8x64xf32>
    %371 = math.tanh %370 : vector<8x64xf32>
    %372 = vector.extract_strided_slice %369 {offsets = [0, 0], sizes = [8, 64], strides = [1, 1]} : vector<8x192xf32> to vector<8x64xf32>
    %373 = vector.extract_strided_slice %369 {offsets = [0, 64], sizes = [8, 64], strides = [1, 1]} : vector<8x192xf32> to vector<8x64xf32>
    %374 = vector.extract_strided_slice %369 {offsets = [0, 128], sizes = [8, 64], strides = [1, 1]} : vector<8x192xf32> to vector<8x64xf32>
    %375 = arith.mulf %373, %358 : vector<8x64xf32>
    %376 = arith.mulf %372, %371 : vector<8x64xf32>
    %377 = arith.addf %375, %376 : vector<8x64xf32>
    %378 = math.tanh %377 : vector<8x64xf32>
    %379 = arith.mulf %374, %378 : vector<8x64xf32>
    %cst_129 = arith.constant dense<0.000000e+00> : vector<8x256xf32>
    %380 = tpu.matmul %379, %300, %cst_129 {dimension_numbers = #tpu.dot_dimension_numbers<[1], [0], [0], [1], [0, 0, 1, 1], [], []>} : vector<8x64xf32>, vector<64x256xf32>, vector<8x256xf32> -> vector<8x256xf32>
    %c32_130 = arith.constant 32 : index
    %c0_131 = arith.constant 0 : index
    %381 = vector.load %arg14[%c32_130, %c0_131] : memref<64x256xf32, #tpu.memory_space<vmem>>, vector<8x256xf32>
    %382 = arith.addf %380, %381 : vector<8x256xf32>
    %383 = vector.extract_strided_slice %382 {offsets = [0, 0], sizes = [8, 192], strides = [1, 1]} : vector<8x256xf32> to vector<8x192xf32>
    %384 = arith.negf %383 : vector<8x192xf32>
    %385 = math.exp %384 : vector<8x192xf32>
    %cst_132 = arith.constant 1.000000e+00 : f32
    %386 = vector.broadcast %cst_132 : f32 to vector<8x192xf32>
    %387 = arith.addf %386, %385 : vector<8x192xf32>
    %388 = arith.divf %386, %387 : vector<8x192xf32>
    %389 = vector.extract_strided_slice %382 {offsets = [0, 192], sizes = [8, 64], strides = [1, 1]} : vector<8x256xf32> to vector<8x64xf32>
    %390 = math.tanh %389 : vector<8x64xf32>
    %391 = vector.extract_strided_slice %388 {offsets = [0, 0], sizes = [8, 64], strides = [1, 1]} : vector<8x192xf32> to vector<8x64xf32>
    %392 = vector.extract_strided_slice %388 {offsets = [0, 64], sizes = [8, 64], strides = [1, 1]} : vector<8x192xf32> to vector<8x64xf32>
    %393 = vector.extract_strided_slice %388 {offsets = [0, 128], sizes = [8, 64], strides = [1, 1]} : vector<8x192xf32> to vector<8x64xf32>
    %394 = arith.mulf %392, %377 : vector<8x64xf32>
    %395 = arith.mulf %391, %390 : vector<8x64xf32>
    %396 = arith.addf %394, %395 : vector<8x64xf32>
    %397 = math.tanh %396 : vector<8x64xf32>
    %398 = arith.mulf %393, %397 : vector<8x64xf32>
    %cst_133 = arith.constant dense<0.000000e+00> : vector<8x256xf32>
    %399 = tpu.matmul %398, %300, %cst_133 {dimension_numbers = #tpu.dot_dimension_numbers<[1], [0], [0], [1], [0, 0, 1, 1], [], []>} : vector<8x64xf32>, vector<64x256xf32>, vector<8x256xf32> -> vector<8x256xf32>
    %c40_134 = arith.constant 40 : index
    %c0_135 = arith.constant 0 : index
    %400 = vector.load %arg14[%c40_134, %c0_135] : memref<64x256xf32, #tpu.memory_space<vmem>>, vector<8x256xf32>
    %401 = arith.addf %399, %400 : vector<8x256xf32>
    %402 = vector.extract_strided_slice %401 {offsets = [0, 0], sizes = [8, 192], strides = [1, 1]} : vector<8x256xf32> to vector<8x192xf32>
    %403 = arith.negf %402 : vector<8x192xf32>
    %404 = math.exp %403 : vector<8x192xf32>
    %cst_136 = arith.constant 1.000000e+00 : f32
    %405 = vector.broadcast %cst_136 : f32 to vector<8x192xf32>
    %406 = arith.addf %405, %404 : vector<8x192xf32>
    %407 = arith.divf %405, %406 : vector<8x192xf32>
    %408 = vector.extract_strided_slice %401 {offsets = [0, 192], sizes = [8, 64], strides = [1, 1]} : vector<8x256xf32> to vector<8x64xf32>
    %409 = math.tanh %408 : vector<8x64xf32>
    %410 = vector.extract_strided_slice %407 {offsets = [0, 0], sizes = [8, 64], strides = [1, 1]} : vector<8x192xf32> to vector<8x64xf32>
    %411 = vector.extract_strided_slice %407 {offsets = [0, 64], sizes = [8, 64], strides = [1, 1]} : vector<8x192xf32> to vector<8x64xf32>
    %412 = vector.extract_strided_slice %407 {offsets = [0, 128], sizes = [8, 64], strides = [1, 1]} : vector<8x192xf32> to vector<8x64xf32>
    %413 = arith.mulf %411, %396 : vector<8x64xf32>
    %414 = arith.mulf %410, %409 : vector<8x64xf32>
    %415 = arith.addf %413, %414 : vector<8x64xf32>
    %416 = math.tanh %415 : vector<8x64xf32>
    %417 = arith.mulf %412, %416 : vector<8x64xf32>
    %cst_137 = arith.constant dense<0.000000e+00> : vector<8x256xf32>
    %418 = tpu.matmul %417, %300, %cst_137 {dimension_numbers = #tpu.dot_dimension_numbers<[1], [0], [0], [1], [0, 0, 1, 1], [], []>} : vector<8x64xf32>, vector<64x256xf32>, vector<8x256xf32> -> vector<8x256xf32>
    %c48_138 = arith.constant 48 : index
    %c0_139 = arith.constant 0 : index
    %419 = vector.load %arg14[%c48_138, %c0_139] : memref<64x256xf32, #tpu.memory_space<vmem>>, vector<8x256xf32>
    %420 = arith.addf %418, %419 : vector<8x256xf32>
    %421 = vector.extract_strided_slice %420 {offsets = [0, 0], sizes = [8, 192], strides = [1, 1]} : vector<8x256xf32> to vector<8x192xf32>
    %422 = arith.negf %421 : vector<8x192xf32>
    %423 = math.exp %422 : vector<8x192xf32>
    %cst_140 = arith.constant 1.000000e+00 : f32
    %424 = vector.broadcast %cst_140 : f32 to vector<8x192xf32>
    %425 = arith.addf %424, %423 : vector<8x192xf32>
    %426 = arith.divf %424, %425 : vector<8x192xf32>
    %427 = vector.extract_strided_slice %420 {offsets = [0, 192], sizes = [8, 64], strides = [1, 1]} : vector<8x256xf32> to vector<8x64xf32>
    %428 = math.tanh %427 : vector<8x64xf32>
    %429 = vector.extract_strided_slice %426 {offsets = [0, 0], sizes = [8, 64], strides = [1, 1]} : vector<8x192xf32> to vector<8x64xf32>
    %430 = vector.extract_strided_slice %426 {offsets = [0, 64], sizes = [8, 64], strides = [1, 1]} : vector<8x192xf32> to vector<8x64xf32>
    %431 = vector.extract_strided_slice %426 {offsets = [0, 128], sizes = [8, 64], strides = [1, 1]} : vector<8x192xf32> to vector<8x64xf32>
    %432 = arith.mulf %430, %415 : vector<8x64xf32>
    %433 = arith.mulf %429, %428 : vector<8x64xf32>
    %434 = arith.addf %432, %433 : vector<8x64xf32>
    %435 = math.tanh %434 : vector<8x64xf32>
    %436 = arith.mulf %431, %435 : vector<8x64xf32>
    %cst_141 = arith.constant dense<0.000000e+00> : vector<8x256xf32>
    %437 = tpu.matmul %436, %300, %cst_141 {dimension_numbers = #tpu.dot_dimension_numbers<[1], [0], [0], [1], [0, 0, 1, 1], [], []>} : vector<8x64xf32>, vector<64x256xf32>, vector<8x256xf32> -> vector<8x256xf32>
    %c56_142 = arith.constant 56 : index
    %c0_143 = arith.constant 0 : index
    %438 = vector.load %arg14[%c56_142, %c0_143] : memref<64x256xf32, #tpu.memory_space<vmem>>, vector<8x256xf32>
    %439 = arith.addf %437, %438 : vector<8x256xf32>
    %440 = vector.extract_strided_slice %439 {offsets = [0, 0], sizes = [8, 192], strides = [1, 1]} : vector<8x256xf32> to vector<8x192xf32>
    %441 = arith.negf %440 : vector<8x192xf32>
    %442 = math.exp %441 : vector<8x192xf32>
    %cst_144 = arith.constant 1.000000e+00 : f32
    %443 = vector.broadcast %cst_144 : f32 to vector<8x192xf32>
    %444 = arith.addf %443, %442 : vector<8x192xf32>
    %445 = arith.divf %443, %444 : vector<8x192xf32>
    %446 = vector.extract_strided_slice %439 {offsets = [0, 192], sizes = [8, 64], strides = [1, 1]} : vector<8x256xf32> to vector<8x64xf32>
    %447 = math.tanh %446 : vector<8x64xf32>
    %448 = vector.extract_strided_slice %445 {offsets = [0, 0], sizes = [8, 64], strides = [1, 1]} : vector<8x192xf32> to vector<8x64xf32>
    %449 = vector.extract_strided_slice %445 {offsets = [0, 64], sizes = [8, 64], strides = [1, 1]} : vector<8x192xf32> to vector<8x64xf32>
    %450 = vector.extract_strided_slice %445 {offsets = [0, 128], sizes = [8, 64], strides = [1, 1]} : vector<8x192xf32> to vector<8x64xf32>
    %451 = arith.mulf %449, %434 : vector<8x64xf32>
    %452 = arith.mulf %448, %447 : vector<8x64xf32>
    %453 = arith.addf %451, %452 : vector<8x64xf32>
    %454 = math.tanh %453 : vector<8x64xf32>
    %455 = arith.mulf %450, %454 : vector<8x64xf32>
    %456 = vector.extract_strided_slice %455 {offsets = [0, 0], sizes = [8, 32], strides = [1, 1]} : vector<8x64xf32> to vector<8x32xf32>
    %457 = tpu.concatenate %456, %322 in 1 : vector<8x32xf32>, vector<8x32xf32> -> vector<8x64xf32>
    %c0_145 = arith.constant 0 : index
    %c0_146 = arith.constant 0 : index
    %458 = vector.load %arg11[%c0_145, %c0_146] : memref<64x3xf32, #tpu.memory_space<vmem>>, vector<64x3xf32>
    %cst_147 = arith.constant dense<0.000000e+00> : vector<8x3xf32>
    %459 = tpu.matmul %457, %458, %cst_147 {dimension_numbers = #tpu.dot_dimension_numbers<[1], [0], [0], [1], [0, 0, 1, 1], [], []>} : vector<8x64xf32>, vector<64x3xf32>, vector<8x3xf32> -> vector<8x3xf32>
    %c0_148 = arith.constant 0 : index
    %c0_149 = arith.constant 0 : index
    %460 = vector.load %arg12[%c0_148, %c0_149] : memref<1x3xf32, #tpu.memory_space<vmem>>, vector<1x3xf32>
    %461 = vector.broadcast %460 : vector<1x3xf32> to vector<8x3xf32>
    %462 = arith.addf %459, %461 : vector<8x3xf32>
    %cst_150 = arith.constant dense<0xFF800000> : vector<8xf32>
    %463 = vector.multi_reduction <maximumf>, %462, %cst_150 [1] : vector<8x3xf32> to vector<8xf32>
    %464 = vector.shape_cast %463 : vector<8xf32> to vector<8x1xf32>
    %465 = vector.broadcast %464 : vector<8x1xf32> to vector<8x3xf32>
    %466 = arith.subf %462, %465 : vector<8x3xf32>
    %467 = math.exp %466 : vector<8x3xf32>
    %cst_151 = arith.constant dense<0.000000e+00> : vector<8xf32>
    %468 = vector.multi_reduction <add>, %467, %cst_151 [1] : vector<8x3xf32> to vector<8xf32>
    %469 = vector.shape_cast %468 : vector<8xf32> to vector<8x1xf32>
    %470 = vector.broadcast %469 : vector<8x1xf32> to vector<8x3xf32>
    %471 = arith.divf %467, %470 : vector<8x3xf32>
    %c0_152 = arith.constant 0 : index
    %c0_153 = arith.constant 0 : index
    %472 = vector.load %arg13[%c0_152, %c0_153] : memref<8x3xf32, #tpu.memory_space<vmem>>, vector<8x3xf32>
    tpu.vector_store %arg13[%c0_152, %c0_153], %471 {strides = array<i32>} : memref<8x3xf32, #tpu.memory_space<vmem>>, vector<8x3xf32>,
    return
  }
}

</mosaic_0001>

<bundles_post_ra>
// kernel: text_model_forward.1
= control target key start
LH: loop header
LB: loop body
LE: loop exit
PB: predicated region body
PF: predicated region fallthrough
CT: control target
= control target key end

     0   :  { %v2901_v3 = vmov 0.0   ;;  %vm75_vm0 = vcmask 130048   ;;  %vm269_vm1 = vcmask 523264   ;;  %v44_v40 = vlaneseq  ;;  %s3839_s1 = inlined_call_operand.vmem [shape: f32[16,256], index: 1, kind: input, shape index: {}]   ;;  %s3840_s3 = inlined_call_operand.vmem [shape: f32[64,256], index: 3, kind: input, shape index: {}]   ;;  %s3841_s0 = inlined_call_operand.vmem [shape: f32[64,16], index: 0, kind: input, shape index: {}]   ;;  %s3842_s4 = inlined_call_operand.vmem [shape: f32[8,64], index: 4, kind: input, shape index: {}]   ;;  %s3843_s2 = inlined_call_operand.vmem [shape: f32[1,256], index: 2, kind: input, shape index: {}]   ;;  %s3844_s5 = inlined_call_operand.vmem [shape: f32[8,64], index: 5, kind: input, shape index: {}]   ;;  %s3845_s6 = inlined_call_operand.vmem [shape: f32[64,256], index: 6, kind: input, shape index: {}]   ;;  %s3846_s8 = inlined_call_operand.vmem [shape: f32[64,256], index: 8, kind: input, shape index: {}]   ;;  %s3847_s9 = inlined_call_operand.vmem [shape: f32[8,64], index: 9, kind: input, shape index: {}]   ;;  %s3848_s10 = inlined_call_operand.vmem [shape: f32[8,64], index: 10, kind: input, shape index: {}]   ;;  %s3849_s7 = inlined_call_operand.vmem [shape: f32[1,256], index: 7, kind: input, shape index: {}]   ;;  %s3850_s11 = inlined_call_operand.vmem [shape: f32[64,3], index: 11, kind: input, shape index: {}]   ;;  %s3851_s12 = inlined_call_operand.vmem [shape: f32[1,3], index: 12, kind: input, shape index: {}]   ;;  %s3852_s13 = inlined_call_operand.vmem [shape: f32[8,3], index: 13, kind: output, shape index: {}]  }
   0x1   :  { %v60_v0 = vld [vmem:[%s3839_s1 + $0x8] sm:$0xff]  ;;  %v62_v1 = vld [vmem:[%s3839_s1 + $0x18] sm:$0xff]  ;;  %v59_v2 = vld [vmem:[%s3839_s1] sm:$0xff]  ;;  %164 = vmatprep.mubr.f32.mxu0 %v2901_v3  ;;  %337 = vmatprep.mubr.f32.mxu1 %v2901_v3  ;;  %vm378_vm4 = vcmask 261120   ;;  %vm380_vm5 = vcmask 523520   ;;  %vm2904_vm6 = vmmov 0  }
   0x2   :  { %v2413_v4 = vpack.c.bf16 %v62_v1, %v60_v0  ;;  %v61_v5 = vld [vmem:[%s3839_s1 + $0x10] sm:$0xff]  ;;  %v250_v7 = vld [vmem:[%s3840_s3 + $0x8] sm:$0xff]  ;;  %v252_v8 = vld [vmem:[%s3840_s3 + $0x18] sm:$0xff]  ;;  %v3124_v41 = vshrl.u32 %v44_v40, 7  ;;  %v45_v50 = vand.u32 127, %v44_v40  ;;  %vm2302_vm7 = vcmask 23552  }
   0x3   :  { %v2415_v6 = vpack.c.bf16 %v61_v5, %v59_v2  ;;  %v249_v9 = vld [vmem:[%s3840_s3] sm:$0xff]  ;;  %v251_v10 = vld [vmem:[%s3840_s3 + $0x10] sm:$0xff]  ;;  %v3004_v12 = vpack.c.bf16 %v252_v8, %v250_v7  ;;  %v254_v14 = vld [vmem:[%s3840_s3 + $0x28] sm:$0xff] }
   0x4   :  { %2414 = vmatprep.subr.bf16.mxu0 %v2413_v4  ;;  %v51_v11 = vld [vmem:[%s3841_s0] sm:$0xff]  ;;  %v3006_v13 = vpack.c.bf16 %v251_v10, %v249_v9  ;;  %v256_v15 = vld [vmem:[%s3840_s3 + $0x38] sm:$0xff]  ;;  %v255_v18 = vld [vmem:[%s3840_s3 + $0x30] sm:$0xff]  ;;  %v67_v42 = vsub.s32 0, %v3124_v41  ;;  %v71_v45 = vsub.s32 1, %v3124_v41  ;;  %v46_v55 = vadd.s32 128, %v45_v50 }
   0x5   :  { %2416 = vmatpush1.bf16.msra.mxu0 %v2415_v6  ;;  %v3014_v16 = vpack.c.bf16 %v256_v15, %v254_v14  ;;  %v253_v17 = vld [vmem:[%s3840_s3 + $0x20] sm:$0xff]  ;;  %2418 = vmatprep.subr.bf16.mxu1 %v3004_v12  ;;  %v258_v19 = vld [vmem:[%s3840_s3 + $0x48] sm:$0xff]  ;;  %v260_v20 = vld [vmem:[%s3840_s3 + $0x58] sm:$0xff]  ;;  %v47_v59 = vand.u32 63, %v45_v50 }
   0x6   :  { %2450 = vmatprep.subr.bf16.mxu0 %v3004_v12  ;;  %2420 = vmatpush1.bf16.msra.mxu1 %v3006_v13  ;;  %v3032_v21 = vpack.c.bf16 %v255_v18, %v253_v17  ;;  %v52_v22 = vld [vmem:[%s3841_s0 + $0x8] sm:$0xff]  ;;  %v3039_v23 = vpack.c.bf16 %v260_v20, %v258_v19  ;;  %v257_v24 = vld [vmem:[%s3840_s3 + $0x40] sm:$0xff]  ;;  %v259_v25 = vld [vmem:[%s3840_s3 + $0x50] sm:$0xff]  ;;  %v48_v61 = vand.u32 63, %v46_v55 }
   0x7   :  { %2422 = vmatprep.subr.bf16.mxu1 %v3014_v16  ;;  %v262_v26 = vld [vmem:[%s3840_s3 + $0x68] sm:$0xff]  ;;  %v264_v27 = vld [vmem:[%s3840_s3 + $0x78] sm:$0xff]  ;;  %v3057_v28 = vpack.c.bf16 %v259_v25, %v257_v24  ;;  %v53_v29 = vld [vmem:[%s3841_s0 + $0x10] sm:$0xff]  ;;  %vm3147_vm2 = vcmp.lt.s32.totalorder %v47_v59, 32 }
   0x8   :  { %2319 = vmatmul.mubr.msk.f32.vlgmr.msra.gmra.mrb[0].mxu0 %vm75_vm0, %v51_v11  ;;  %v3064_v30 = vpack.c.bf16 %v264_v27, %v262_v26  ;;  %v261_v31 = vld [vmem:[%s3840_s3 + $0x60] sm:$0xff]  ;;  %v263_v32 = vld [vmem:[%s3840_s3 + $0x70] sm:$0xff]  ;;  %v54_v34 = vld [vmem:[%s3841_s0 + $0x18] sm:$0xff]  ;;  %vm3151_vm3 = vcmp.lt.s32.totalorder %v48_v61, 32 }
   0x9   :  { %170 = vmatprep.mubr.f32.mxu0 %v2901_v3  ;;  %2452 = vmatpush1.bf16.msra.mxu0 %v3006_v13  ;;  %v3076_v33 = vpack.c.bf16 %v263_v32, %v261_v31  ;;  %v265_v35 = vld [vmem:[%s3842_s4] sm:$0xff]  ;;  %v56_v37 = vld [vmem:[%s3841_s0 + $0x28] sm:$0xff]  ;;  %v57_v38 = vld [vmem:[%s3841_s0 + $0x30] sm:$0xff] }
   0xa   :  { %2454 = vmatprep.subr.bf16.mxu0 %v3014_v16  ;;  %2424 = vmatpush1.bf16.msra.mxu1 %v3032_v21  ;;  %v55_v36 = vld [vmem:[%s3841_s0 + $0x20] sm:$0xff]  ;;  %v58_v39 = vld [vmem:[%s3841_s0 + $0x38] sm:$0xff]  ;;  %s2902_s0 = smov 64  }
   0xb   :  { %2426 = vmatprep.subr.bf16.mxu1 %v3039_v23  ;;  %v63_v43 = vld [vmem:[%s3843_s2] sm:$0x3] }
   0xc   :  { %2320 = vmatmul.mubr.msk.f32.gmra.mrb[2].mxu0 %vm75_vm0, %v52_v22  ;;  %v68_v47 = vrot.slane %v63_v43, %v67_v42  ;;  %v72_v48 = vrot.slane %v63_v43, %v71_v45  ;;  %v2214_v6 = vld [vmem:[%s3850_s11] sm:$0xff] }
   0xd   :  { %176 = vmatprep.mubr.f32.mxu0 %v2901_v3  ;;  %2456 = vmatpush1.bf16.msra.mxu0 %v3032_v21 }
   0xe   :  { %2458 = vmatprep.subr.bf16.mxu0 %v3039_v23  ;;  %2428 = vmatpush1.bf16.msra.mxu1 %v3057_v28 }
   0xf   :  { %2430 = vmatprep.subr.bf16.mxu1 %v3064_v30 }
  0x10   :  { %2321 = vmatmul.mubr.msk.f32.gmra.mrb[4].mxu0 %vm75_vm0, %v53_v29 }
  0x11   :  { %182 = vmatprep.mubr.f32.mxu0 %v2901_v3  ;;  %2460 = vmatpush1.bf16.msra.mxu0 %v3057_v28 }
  0x12   :  { %2462 = vmatprep.subr.bf16.mxu0 %v3064_v30  ;;  %2432 = vmatpush1.bf16.msra.mxu1 %v3076_v33 }
  0x13   :  { %2434 = vmatprep.subr.bf16.mxu1 %v3004_v12 }
  0x14   :  { %2322 = vmatmul.mubr.msk.f32.gmra.mrb[6].mxu0 %vm75_vm0, %v54_v34 }
  0x15   :  { %188 = vmatprep.mubr.f32.mxu0 %v2901_v3  ;;  %2464 = vmatpush1.bf16.msra.mxu0 %v3076_v33 }
  0x16   :  { %2327 = vmatmul.mubr.msk.f32.vlgmr.msra.gmra.mrb[0].mxu1 %vm269_vm1, %v265_v35  ;;  %2482 = vmatprep.subr.bf16.mxu0 %v3004_v12 }
  0x17   :  { %2436 = vmatpush1.bf16.msra.mxu1 %v3006_v13  ;;  %451 = vmatprep.mubr.f32.mxu1 %v2901_v3 }
  0x18   :  { %2323 = vmatmul.mubr.msk.f32.gmra.mrb[8].mxu0 %vm75_vm0, %v55_v36  ;;  %2438 = vmatprep.subr.bf16.mxu1 %v3014_v16 }
  0x19   :  { %194 = vmatprep.mubr.f32.mxu0 %v2901_v3 }
  0x1b   :  { %2440 = vmatpush1.bf16.msra.mxu1 %v3032_v21 }
  0x1c   :  { %2324 = vmatmul.mubr.msk.f32.gmra.mrb[10].mxu0 %vm75_vm0, %v56_v37  ;;  %2442 = vmatprep.subr.bf16.mxu1 %v3039_v23 }
  0x1d   :  { %200 = vmatprep.mubr.f32.mxu0 %v2901_v3 }
  0x1f   :  { %2444 = vmatpush1.bf16.msra.mxu1 %v3057_v28 }
  0x20   :  { %2325 = vmatmul.mubr.msk.f32.gmra.mrb[12].mxu0 %vm75_vm0, %v57_v38  ;;  %2446 = vmatprep.subr.bf16.mxu1 %v3064_v30 }
  0x21   :  { %206 = vmatprep.mubr.f32.mxu0 %v2901_v3 }
  0x23   :  { %2448 = vmatpush1.bf16.msra.mxu1 %v3076_v33 }
  0x24   :  { %2326 = vmatmul.mubr.msk.f32.gmra.mrb[14].mxu0 %vm75_vm0, %v58_v39  ;;  %2466 = vmatprep.subr.bf16.mxu1 %v3004_v12 }
  0x25   :  { %559 = vmatprep.mubr.f32.mxu0 %v2901_v3 }
  0xdb   :  { %v166_v44 = vpop.f32.mrb[0].mxu0 }
  0xdc   :  { %v168_v46 = vpop.f32.mrb[1].mxu0  ;;  %v3215_v39 = vadd.f32 %v166_v44, %v68_v47 }
  0xdf   :  { %v172_v49 = vpop.f32.mrb[2].mxu0 }
  0xe0   :  { %v3135_v51 = vadd.f32 %v172_v49, %v68_v47  ;;  %v174_v52 = vpop.f32.mrb[3].mxu0  ;;  %v3219_v49 = vadd.f32 %v168_v46, %v72_v48 }
  0xe1   :  { %v3137_v53 = vadd.f32 %v174_v52, %v72_v48 }
  0xe3   :  { %v178_v54 = vpop.f32.mrb[4].mxu0 }
  0xe4   :  { %v3139_v56 = vadd.f32 %v178_v54, %v68_v47  ;;  %v180_v57 = vpop.f32.mrb[5].mxu0 }
  0xe5   :  { %v3141_v58 = vadd.f32 %v180_v57, %v72_v48  ;;  %v266_v57 = vld [vmem:[%s3844_s5] sm:$0xff] }
  0xe7   :  { %v184_v60 = vpop.f32.mrb[6].mxu0 }
  0xe8   :  { %v3143_v62 = vadd.f32 %v184_v60, %v68_v47  ;;  %v186_v63 = vpop.f32.mrb[7].mxu0 }
  0xe9   :  { %v3145_v0 = vadd.f32 %v186_v63, %v72_v48  ;;  %v339_v1 = vpop.f32.mrb[0].mxu1 }
  0xea   :  { %v341_v5 = vpop.f32.mrb[1].mxu1 }
  0xeb   :  { %v190_v4 = vpop.f32.mrb[8].mxu0 }
  0xec   :  { %v3155_v7 = vadd.f32 %v190_v4, %v68_v47  ;;  %v192_v8 = vpop.f32.mrb[9].mxu0 }
  0xed   :  { %v3157_v9 = vadd.f32 %v192_v8, %v72_v48 }
  0xee   :  { %v229_v10 = vsel %vm3147_vm2, %v3143_v62, %v3155_v7  ;;  %v233_v11 = vsel %vm3147_vm2, %v3155_v7, %v3143_v62 }
  0xef   :  { %v196_v14 = vpop.f32.mrb[10].mxu0  ;;  %v230_v15 = vsel %vm3151_vm3, %v3145_v0, %v3157_v9  ;;  %v234_v17 = vsel %vm3151_vm3, %v3157_v9, %v3145_v0 }
  0xf0   :  { %v3175_v18 = vadd.f32 %v196_v14, %v68_v47  ;;  %v198_v19 = vpop.f32.mrb[11].mxu0 }
  0xf1   :  { %v3177_v20 = vadd.f32 %v198_v19, %v72_v48 }
  0xf2   :  { %v225_v22 = vsel %vm3147_vm2, %v3139_v56, %v3175_v18  ;;  %v237_v24 = vsel %vm3147_vm2, %v3175_v18, %v3139_v56 }
  0xf3   :  { %v202_v25 = vpop.f32.mrb[12].mxu0  ;;  %v226_v26 = vsel %vm3151_vm3, %v3141_v58, %v3177_v20  ;;  %v238_v27 = vsel %vm3151_vm3, %v3177_v20, %v3141_v58 }
  0xf4   :  { %v3195_v29 = vadd.f32 %v202_v25, %v68_v47  ;;  %v204_v31 = vpop.f32.mrb[13].mxu0 }
  0xf5   :  { %v3197_v32 = vadd.f32 %v204_v31, %v72_v48 }
  0xf6   :  { %v221_v34 = vsel %vm3147_vm2, %v3135_v51, %v3195_v29  ;;  %v241_v35 = vsel %vm3147_vm2, %v3195_v29, %v3135_v51 }
  0xf7   :  { %v208_v36 = vpop.f32.mrb[14].mxu0  ;;  %v222_v37 = vsel %vm3151_vm3, %v3137_v53, %v3197_v32  ;;  %v242_v38 = vsel %vm3151_vm3, %v3197_v32, %v3137_v53 }
  0xf8   :  { %v3217_v40 = vadd.f32 %v208_v36, %v68_v47  ;;  %v210_v43 = vpop.f32.mrb[15].mxu0 }
  0xf9   :  { %v3221_v50 = vadd.f32 %v210_v43, %v72_v48 }
  0xfa   :  { %v217_v52 = vsel %vm3147_vm2, %v3215_v39, %v3217_v40  ;;  %v245_v54 = vsel %vm3147_vm2, %v3217_v40, %v3215_v39 }
  0xfb   :  { %v340_v55 = vadd.f32 %v339_v1, %v217_v52  ;;  %v218_v44 = vsel %vm3151_vm3, %v3219_v49, %v3221_v50  ;;  %v246_v46 = vsel %vm3151_vm3, %v3221_v50, %v3219_v49  ;;  %v1147_v49 = vld [vmem:[%s3845_s6 + $0x8] sm:$0xff]  ;;  %v1149_v50 = vld [vmem:[%s3845_s6 + $0x18] sm:$0xff] }
  0xfc   :  { %v342_v47 = vadd.f32 %v341_v5, %v218_v44 }
  0xfd   :  { %v2328_v59 = vmul.f32 -1.442695, %v340_v55 }
  0xfe   :  { %2705 = vtanh.f32 %v342_v47  ;;  %v2329_v31 = vmul.f32 -1.442695, %v342_v47 }
  0xff   :  { %2707 = vpow2.f32 %v2328_v59 }
 0x108   :  { %v2706_v48 = vpop.eup %2705 }
 0x109   :  { %363 = vrot.lane.b32.xlu0 %v2706_v48, %s2902_s0  ;;  %v2708_v60 = vpop.eup %2707 }
 0x10a   :  { %v350_v61 = vadd.f32 1.0, %v2708_v60 }
 0x10c   :  { %2709 = vrcp.f32 %v350_v61 }
 0x10d   :  { %358 = vrot.lane.b32.xlu0 %v266_v57, %s2902_s0 }
 0x116   :  { %v2710_v63 = vpop.eup %2709 }
 0x17b   :  { %v364_v1 = vpop.permute.xlu0 %363 }
 0x17c   :  { %v366_v4 = vmul.f32 %v2710_v63, %v364_v1 }
 0x17e   :  { %368 = vrot.lane.b32.xlu1 %v366_v4, %s2902_s0 }
 0x17f   :  { %v359_v5 = vpop.permute.xlu0 %358 }
 0x180   :  { %v361_v8 = vmul.f32 %v2710_v63, %v359_v5 }
 0x1f0   :  { %v369_v14 = vpop.permute.xlu1 %368 }
 0x1f1   :  { %v371_v19 = vadd.f32 %v369_v14, %v361_v8 }
 0x1f3   :  { %2711 = vtanh.f32 %v371_v19 }
 0x1f4   :  { %2713 = vpow2.f32 %v2329_v31 }
 0x1fd   :  { %v2712_v25 = vpop.eup %2711 }
 0x1fe   :  { %374 = vrot.lane.b32.xlu1 %v2712_v25, %s2902_s0  ;;  %v2714_v36 = vpop.eup %2713 }
 0x1ff   :  { %v351_v43 = vadd.f32 1.0, %v2714_v36 }
 0x201   :  { %2715 = vrcp.f32 %v351_v43 }
 0x20b   :  { %v2716_v52 = vpop.eup %2715 }
 0x270   :  { %v375_v55 = vpop.permute.xlu1 %374 }
 0x271   :  { %v377_v44 = vmul.f32 %v2716_v52, %v375_v55 }
 0x273   :  { %379 = vst.msk [vmem:[#allocation3] sm:$0xff] %vm378_vm4, %v377_v44  ;;  %2330 = vmatmul.mubr.msk.f32.vlgmr.msra.gmra.mrb[2].mxu1 %vm269_vm1, %v377_v44 }
 0x274   :  { %381 = vst.msk [vmem:[#allocation3 + $0x38] sm:$0xff] %vm380_vm5, %v377_v44  ;;  %2468 = vmatpush1.bf16.msra.mxu1 %v3006_v13  ;;  %667 = vmatprep.mubr.f32.mxu1 %v2901_v3 }
 0x275   :  { %2470 = vmatprep.subr.bf16.mxu1 %v3014_v16 }
 0x278   :  { %2472 = vmatpush1.bf16.msra.mxu1 %v3032_v21 }
 0x279   :  { %2474 = vmatprep.subr.bf16.mxu1 %v3039_v23 }
 0x27c   :  { %2476 = vmatpush1.bf16.msra.mxu1 %v3057_v28 }
 0x27d   :  { %2478 = vmatprep.subr.bf16.mxu1 %v3064_v30 }
 0x280   :  { %2480 = vmatpush1.bf16.msra.mxu1 %v3076_v33 }
 0x281   :  { %2498 = vmatprep.subr.bf16.mxu1 %v3004_v12 }
 0x346   :  { %v453_v47 = vpop.f32.mrb[2].mxu1 }
 0x347   :  { %v454_v48 = vadd.f32 %v453_v47, %v221_v34  ;;  %v455_v57 = vpop.f32.mrb[3].mxu1 }
 0x348   :  { %v456_v59 = vadd.f32 %v455_v57, %v222_v37 }
 0x349   :  { %v2331_v61 = vmul.f32 -1.442695, %v454_v48 }
 0x34a   :  { %2717 = vtanh.f32 %v456_v59  ;;  %v2332_v37 = vmul.f32 -1.442695, %v456_v59 }
 0x34b   :  { %2719 = vpow2.f32 %v2331_v61 }
 0x354   :  { %v2718_v60 = vpop.eup %2717 }
 0x355   :  { %473 = vrot.lane.b32.xlu0 %v2718_v60, %s2902_s0  ;;  %v2720_v63 = vpop.eup %2719 }
 0x356   :  { %v464_v1 = vadd.f32 1.0, %v2720_v63 }
 0x358   :  { %2721 = vrcp.f32 %v464_v1 }
 0x362   :  { %v2722_v4 = vpop.eup %2721 }
 0x363   :  { %v471_v14 = vmul.f32 %v2722_v4, %v371_v19 }
 0x3c7   :  { %v474_v5 = vpop.permute.xlu0 %473 }
 0x3c8   :  { %v476_v8 = vmul.f32 %v2722_v4, %v474_v5 }
 0x3ca   :  { %478 = vrot.lane.b32.xlu1 %v476_v8, %s2902_s0 }
 0x43c   :  { %v479_v25 = vpop.permute.xlu1 %478 }
 0x43d   :  { %v481_v31 = vadd.f32 %v479_v25, %v471_v14 }
 0x43f   :  { %2723 = vtanh.f32 %v481_v31 }
 0x440   :  { %2725 = vpow2.f32 %v2332_v37 }
 0x449   :  { %v2724_v34 = vpop.eup %2723 }
 0x44a   :  { %484 = vrot.lane.b32.xlu0 %v2724_v34, %s2902_s0  ;;  %v2726_v36 = vpop.eup %2725 }
 0x44b   :  { %v465_v43 = vadd.f32 1.0, %v2726_v36 }
 0x44d   :  { %2727 = vrcp.f32 %v465_v43 }
 0x457   :  { %v2728_v52 = vpop.eup %2727 }
 0x4bc   :  { %v485_v55 = vpop.permute.xlu0 %484 }
 0x4bd   :  { %v487_v44 = vmul.f32 %v2728_v52, %v485_v55 }
 0x4bf   :  { %488 = vst.msk [vmem:[#allocation3 + $0x8] sm:$0xff] %vm378_vm4, %v487_v44  ;;  %2333 = vmatmul.mubr.msk.f32.vlgmr.msra.gmra.mrb[16].mxu0 %vm269_vm1, %v487_v44 }
 0x4c0   :  { %489 = vst.msk [vmem:[#allocation3 + $0x30] sm:$0xff] %vm380_vm5, %v487_v44  ;;  %2484 = vmatpush1.bf16.msra.mxu0 %v3006_v13  ;;  %775 = vmatprep.mubr.f32.mxu0 %v2901_v3 }
 0x4c1   :  { %2486 = vmatprep.subr.bf16.mxu0 %v3014_v16 }
 0x4c4   :  { %2488 = vmatpush1.bf16.msra.mxu0 %v3032_v21 }
 0x4c5   :  { %2490 = vmatprep.subr.bf16.mxu0 %v3039_v23 }
 0x4c8   :  { %2492 = vmatpush1.bf16.msra.mxu0 %v3057_v28 }
 0x4c9   :  { %2494 = vmatprep.subr.bf16.mxu0 %v3064_v30 }
 0x4cc   :  { %2496 = vmatpush1.bf16.msra.mxu0 %v3076_v33 }
 0x4cd   :  { %2514 = vmatprep.subr.bf16.mxu0 %v3004_v12 }
 0x592   :  { %v561_v19 = vpop.f32.mrb[16].mxu0 }
 0x593   :  { %v562_v47 = vadd.f32 %v561_v19, %v225_v22  ;;  %v563_v48 = vpop.f32.mrb[17].mxu0 }
 0x594   :  { %v564_v57 = vadd.f32 %v563_v48, %v226_v26 }
 0x595   :  { %v2334_v60 = vmul.f32 -1.442695, %v562_v47 }
 0x596   :  { %2729 = vtanh.f32 %v564_v57  ;;  %v2335_v26 = vmul.f32 -1.442695, %v564_v57 }
 0x597   :  { %2731 = vpow2.f32 %v2334_v60 }
 0x5a0   :  { %v2730_v59 = vpop.eup %2729 }
 0x5a1   :  { %581 = vrot.lane.b32.xlu1 %v2730_v59, %s2902_s0  ;;  %v2732_v61 = vpop.eup %2731 }
 0x5a2   :  { %v572_v63 = vadd.f32 1.0, %v2732_v61 }
 0x5a4   :  { %2733 = vrcp.f32 %v572_v63 }
 0x5ae   :  { %v2734_v1 = vpop.eup %2733 }
 0x5af   :  { %v579_v22 = vmul.f32 %v2734_v1, %v481_v31 }
 0x613   :  { %v582_v4 = vpop.permute.xlu1 %581 }
 0x614   :  { %v584_v5 = vmul.f32 %v2734_v1, %v582_v4 }
 0x616   :  { %586 = vrot.lane.b32.xlu0 %v584_v5, %s2902_s0 }
 0x688   :  { %v587_v8 = vpop.permute.xlu0 %586 }
 0x689   :  { %v589_v14 = vadd.f32 %v587_v8, %v579_v22 }
 0x68b   :  { %2735 = vtanh.f32 %v589_v14 }
 0x68c   :  { %2737 = vpow2.f32 %v2335_v26 }
 0x695   :  { %v2736_v25 = vpop.eup %2735 }
 0x696   :  { %592 = vrot.lane.b32.xlu1 %v2736_v25, %s2902_s0  ;;  %v2738_v34 = vpop.eup %2737 }
 0x697   :  { %v573_v37 = vadd.f32 1.0, %v2738_v34 }
 0x699   :  { %2739 = vrcp.f32 %v573_v37 }
 0x6a3   :  { %v2740_v36 = vpop.eup %2739 }
 0x708   :  { %v593_v43 = vpop.permute.xlu1 %592 }
 0x709   :  { %v595_v52 = vmul.f32 %v2740_v36, %v593_v43 }
 0x70b   :  { %596 = vst.msk [vmem:[#allocation3 + $0x10] sm:$0xff] %vm378_vm4, %v595_v52  ;;  %2336 = vmatmul.mubr.msk.f32.vlgmr.msra.gmra.mrb[4].mxu1 %vm269_vm1, %v595_v52 }
 0x70c   :  { %597 = vst.msk [vmem:[#allocation3 + $0x28] sm:$0xff] %vm380_vm5, %v595_v52  ;;  %2500 = vmatpush1.bf16.msra.mxu1 %v3006_v13  ;;  %883 = vmatprep.mubr.f32.mxu1 %v2901_v3 }
 0x70d   :  { %2502 = vmatprep.subr.bf16.mxu1 %v3014_v16 }
 0x710   :  { %2504 = vmatpush1.bf16.msra.mxu1 %v3032_v21 }
 0x711   :  { %2506 = vmatprep.subr.bf16.mxu1 %v3039_v23 }
 0x714   :  { %2508 = vmatpush1.bf16.msra.mxu1 %v3057_v28 }
 0x715   :  { %2510 = vmatprep.subr.bf16.mxu1 %v3064_v30 }
 0x718   :  { %2512 = vmatpush1.bf16.msra.mxu1 %v3076_v33 }
 0x719   :  { %2530 = vmatprep.subr.bf16.mxu1 %v3004_v12 }
 0x7de   :  { %v669_v31 = vpop.f32.mrb[4].mxu1 }
 0x7df   :  { %v670_v55 = vadd.f32 %v669_v31, %v229_v10  ;;  %v671_v44 = vpop.f32.mrb[5].mxu1 }
 0x7e0   :  { %v672_v19 = vadd.f32 %v671_v44, %v230_v15 }
 0x7e1   :  { %v2337_v48 = vmul.f32 -1.442695, %v670_v55 }
 0x7e2   :  { %2741 = vtanh.f32 %v672_v19  ;;  %v2338_v15 = vmul.f32 -1.442695, %v672_v19 }
 0x7e3   :  { %2743 = vpow2.f32 %v2337_v48 }
 0x7ec   :  { %v2742_v47 = vpop.eup %2741 }
 0x7ed   :  { %689 = vrot.lane.b32.xlu0 %v2742_v47, %s2902_s0  ;;  %v2744_v12 = vpop.eup %2743 }
 0x7ee   :  { %v680_v57 = vadd.f32 1.0, %v2744_v12 }
 0x7f0   :  { %2745 = vrcp.f32 %v680_v57 }
 0x7fa   :  { %v2746_v59 = vpop.eup %2745 }
 0x7fb   :  { %v687_v10 = vmul.f32 %v2746_v59, %v589_v14 }
 0x85f   :  { %v690_v60 = vpop.permute.xlu0 %689 }
 0x860   :  { %v692_v61 = vmul.f32 %v2746_v59, %v690_v60 }
 0x862   :  { %694 = vrot.lane.b32.xlu1 %v692_v61, %s2902_s0 }
 0x8d4   :  { %v695_v63 = vpop.permute.xlu1 %694 }
 0x8d5   :  { %v697_v1 = vadd.f32 %v695_v63, %v687_v10 }
 0x8d7   :  { %2747 = vtanh.f32 %v697_v1 }
 0x8d8   :  { %2749 = vpow2.f32 %v2338_v15 }
 0x8e1   :  { %v2748_v4 = vpop.eup %2747 }
 0x8e2   :  { %700 = vrot.lane.b32.xlu0 %v2748_v4, %s2902_s0  ;;  %v2750_v5 = vpop.eup %2749 }
 0x8e3   :  { %v681_v22 = vadd.f32 1.0, %v2750_v5 }
 0x8e5   :  { %2751 = vrcp.f32 %v681_v22 }
 0x8ef   :  { %v2752_v8 = vpop.eup %2751 }
 0x954   :  { %v701_v25 = vpop.permute.xlu0 %700 }
 0x955   :  { %v703_v26 = vmul.f32 %v2752_v8, %v701_v25 }
 0x957   :  { %704 = vst.msk [vmem:[#allocation3 + $0x18] sm:$0xff] %vm378_vm4, %v703_v26  ;;  %2339 = vmatmul.mubr.msk.f32.vlgmr.msra.gmra.mrb[18].mxu0 %vm269_vm1, %v703_v26 }
 0x958   :  { %705 = vst.msk [vmem:[#allocation3 + $0x20] sm:$0xff] %vm380_vm5, %v703_v26  ;;  %2516 = vmatpush1.bf16.msra.mxu0 %v3006_v13  ;;  %991 = vmatprep.mubr.f32.mxu0 %v2901_v3 }
 0x959   :  { %2518 = vmatprep.subr.bf16.mxu0 %v3014_v16 }
 0x95c   :  { %2520 = vmatpush1.bf16.msra.mxu0 %v3032_v21 }
 0x95d   :  { %2522 = vmatprep.subr.bf16.mxu0 %v3039_v23 }
 0x960   :  { %2524 = vmatpush1.bf16.msra.mxu0 %v3057_v28 }
 0x961   :  { %2526 = vmatprep.subr.bf16.mxu0 %v3064_v30 }
 0x964   :  { %2528 = vmatpush1.bf16.msra.mxu0 %v3076_v33 }
 0xa2a   :  { %v777_v14 = vpop.f32.mrb[18].mxu0 }
 0xa2b   :  { %v778_v34 = vadd.f32 %v777_v14, %v233_v11  ;;  %v779_v37 = vpop.f32.mrb[19].mxu0 }
 0xa2c   :  { %v780_v36 = vadd.f32 %v779_v37, %v234_v17 }
 0xa2d   :  { %v2340_v52 = vmul.f32 -1.442695, %v778_v34 }
 0xa2e   :  { %2753 = vtanh.f32 %v780_v36  ;;  %v2341_v9 = vmul.f32 -1.442695, %v780_v36 }
 0xa2f   :  { %2755 = vpow2.f32 %v2340_v52 }
 0xa38   :  { %v2754_v43 = vpop.eup %2753 }
 0xa39   :  { %797 = vrot.lane.b32.xlu1 %v2754_v43, %s2902_s0  ;;  %v2756_v31 = vpop.eup %2755 }
 0xa3a   :  { %v788_v55 = vadd.f32 1.0, %v2756_v31 }
 0xa3c   :  { %2757 = vrcp.f32 %v788_v55 }
 0xa46   :  { %v2758_v44 = vpop.eup %2757 }
 0xa47   :  { %v795_v7 = vmul.f32 %v2758_v44, %v697_v1 }
 0xaab   :  { %v798_v19 = vpop.permute.xlu1 %797 }
 0xaac   :  { %v800_v62 = vmul.f32 %v2758_v44, %v798_v19 }
 0xaae   :  { %802 = vrot.lane.b32.xlu0 %v800_v62, %s2902_s0 }
 0xb20   :  { %v803_v11 = vpop.permute.xlu0 %802 }
 0xb21   :  { %v805_v47 = vadd.f32 %v803_v11, %v795_v7 }
 0xb23   :  { %2759 = vtanh.f32 %v805_v47 }
 0xb24   :  { %2761 = vpow2.f32 %v2341_v9 }
 0xb2d   :  { %v2760_v0 = vpop.eup %2759 }
 0xb2e   :  { %808 = vrot.lane.b32.xlu1 %v2760_v0, %s2902_s0  ;;  %v2762_v17 = vpop.eup %2761 }
 0xb2f   :  { %v789_v48 = vadd.f32 1.0, %v2762_v17 }
 0xb31   :  { %2763 = vrcp.f32 %v789_v48 }
 0xb3b   :  { %v2764_v12 = vpop.eup %2763 }
 0xba0   :  { %v809_v57 = vpop.permute.xlu1 %808 }
 0xba1   :  { %v811_v59 = vmul.f32 %v2764_v12, %v809_v57  ;;  %v2545_v57 = vpack.c.bf16 %v1149_v50, %v1147_v49 }
 0xba3   :  { %812 = vst.msk [vmem:[#allocation3 + $0x20] sm:$0xff] %vm378_vm4, %v811_v59  ;;  %2342 = vmatmul.mubr.msk.f32.vlgmr.msra.gmra.mrb[6].mxu1 %vm269_vm1, %v811_v59  ;;  %2546 = vmatprep.subr.bf16.mxu0 %v2545_v57 }
 0xba4   :  { %813 = vst.msk [vmem:[#allocation3 + $0x18] sm:$0xff] %vm380_vm5, %v811_v59  ;;  %2532 = vmatpush1.bf16.msra.mxu1 %v3006_v13  ;;  %1099 = vmatprep.mubr.f32.mxu1 %v2901_v3  ;;  %v1148_v59 = vld [vmem:[%s3845_s6 + $0x10] sm:$0xff] }
 0xba5   :  { %2534 = vmatprep.subr.bf16.mxu1 %v3014_v16 }
 0xba8   :  { %2536 = vmatpush1.bf16.msra.mxu1 %v3032_v21 }
 0xba9   :  { %2538 = vmatprep.subr.bf16.mxu1 %v3039_v23 }
 0xbac   :  { %2540 = vmatpush1.bf16.msra.mxu1 %v3057_v28 }
 0xbad   :  { %2542 = vmatprep.subr.bf16.mxu1 %v3064_v30 }
 0xbb0   :  { %2544 = vmatpush1.bf16.msra.mxu1 %v3076_v33 }
 0xc76   :  { %v885_v60 = vpop.f32.mrb[6].mxu1 }
 0xc77   :  { %v886_v13 = vadd.f32 %v885_v60, %v237_v24  ;;  %v887_v61 = vpop.f32.mrb[7].mxu1  ;;  %v1151_v60 = vld [vmem:[%s3845_s6 + $0x28] sm:$0xff] }
 0xc78   :  { %v888_v16 = vadd.f32 %v887_v61, %v238_v27 }
 0xc79   :  { %v2343_v23 = vmul.f32 -1.442695, %v886_v13  ;;  %v1153_v13 = vld [vmem:[%s3845_s6 + $0x38] sm:$0xff] }
 0xc7a   :  { %2765 = vtanh.f32 %v888_v16  ;;  %v2344_v20 = vmul.f32 -1.442695, %v888_v16  ;;  %v2549_v16 = vpack.c.bf16 %v1153_v13, %v1151_v60  ;;  %v1141_v60 = vld [vmem:[#allocation3 + $0x18] sm:$0xff]  ;;  %v1142_v13 = vld [vmem:[#allocation3 + $0x20] sm:$0xff] }
 0xc7b   :  { %2767 = vpow2.f32 %v2343_v23  ;;  %v1152_v23 = vld [vmem:[%s3845_s6 + $0x30] sm:$0xff] }
 0xc84   :  { %v2766_v21 = vpop.eup %2765 }
 0xc85   :  { %905 = vrot.lane.b32.xlu0 %v2766_v21, %s2902_s0  ;;  %v2768_v28 = vpop.eup %2767  ;;  %v1150_v21 = vld [vmem:[%s3845_s6 + $0x20] sm:$0xff] }
 0xc86   :  { %v896_v30 = vadd.f32 1.0, %v2768_v28  ;;  %v2551_v28 = vpack.c.bf16 %v1152_v23, %v1150_v21 }
 0xc88   :  { %2769 = vrcp.f32 %v896_v30 }
 0xc92   :  { %v2770_v33 = vpop.eup %2769 }
 0xc93   :  { %v903_v18 = vmul.f32 %v2770_v33, %v805_v47 }
 0xcf7   :  { %v906_v10 = vpop.permute.xlu0 %905 }
 0xcf8   :  { %v908_v56 = vmul.f32 %v2770_v33, %v906_v10  ;;  %v1155_v10 = vld [vmem:[%s3845_s6 + $0x48] sm:$0xff] }
 0xcfa   :  { %910 = vrot.lane.b32.xlu1 %v908_v56, %s2902_s0  ;;  %v1157_v56 = vld [vmem:[%s3845_s6 + $0x58] sm:$0xff] }
 0xd6c   :  { %v911_v24 = vpop.permute.xlu1 %910 }
 0xd6d   :  { %v913_v63 = vadd.f32 %v911_v24, %v903_v18  ;;  %v2553_v24 = vpack.c.bf16 %v1157_v56, %v1155_v10 }
 0xd6f   :  { %2771 = vtanh.f32 %v913_v63 }
 0xd70   :  { %2773 = vpow2.f32 %v2344_v20 }
 0xd79   :  { %v2772_v58 = vpop.eup %2771 }
 0xd7a   :  { %916 = vrot.lane.b32.xlu0 %v2772_v58, %s2902_s0  ;;  %v2774_v27 = vpop.eup %2773  ;;  %v1156_v58 = vld [vmem:[%s3845_s6 + $0x50] sm:$0xff] }
 0xd7b   :  { %v897_v1 = vadd.f32 1.0, %v2774_v27  ;;  %v1159_v27 = vld [vmem:[%s3845_s6 + $0x68] sm:$0xff] }
 0xd7d   :  { %2775 = vrcp.f32 %v897_v1  ;;  %v1161_v1 = vld [vmem:[%s3845_s6 + $0x78] sm:$0xff] }
 0xd87   :  { %v2776_v4 = vpop.eup %2775 }
 0xdec   :  { %v917_v15 = vpop.permute.xlu0 %916 }
 0xded   :  { %v919_v5 = vmul.f32 %v2776_v4, %v917_v15  ;;  %v1158_v4 = vld [vmem:[%s3845_s6 + $0x60] sm:$0xff]  ;;  %v2557_v15 = vpack.c.bf16 %v1161_v1, %v1159_v27 }
 0xdef   :  { %920 = vst.msk [vmem:[#allocation3 + $0x28] sm:$0xff] %vm378_vm4, %v919_v5  ;;  %2345 = vmatmul.mubr.msk.f32.vlgmr.msra.gmra.mrb[20].mxu0 %vm269_vm1, %v919_v5 }
 0xdf0   :  { %921 = vst.msk [vmem:[#allocation3 + $0x10] sm:$0xff] %vm380_vm5, %v919_v5  ;;  %1262 = vmatprep.mubr.f32.mxu0 %v2901_v3  ;;  %v1160_v5 = vld [vmem:[%s3845_s6 + $0x70] sm:$0xff] }
 0xec2   :  { %v993_v22 = vpop.f32.mrb[20].mxu0 }
 0xec3   :  { %v994_v8 = vadd.f32 %v993_v22, %v241_v35  ;;  %v995_v25 = vpop.f32.mrb[21].mxu0  ;;  %v2559_v22 = vpack.c.bf16 %v1160_v5, %v1158_v4 }
 0xec4   :  { %v996_v26 = vadd.f32 %v995_v25, %v242_v38  ;;  %v1344_v25 = vld [vmem:[%s3846_s8 + $0x8] sm:$0xff] }
 0xec5   :  { %v2346_v34 = vmul.f32 -1.442695, %v994_v8 }
 0xec6   :  { %2777 = vtanh.f32 %v996_v26  ;;  %v2347_v32 = vmul.f32 -1.442695, %v996_v26  ;;  %v1346_v26 = vld [vmem:[%s3846_s8 + $0x18] sm:$0xff] }
 0xec7   :  { %2779 = vpow2.f32 %v2346_v34  ;;  %v1343_v34 = vld [vmem:[%s3846_s8] sm:$0xff] }
 0xed0   :  { %v2778_v14 = vpop.eup %2777 }
 0xed1   :  { %1013 = vrot.lane.b32.xlu1 %v2778_v14, %s2902_s0  ;;  %v2780_v37 = vpop.eup %2779  ;;  %v3450_v14 = vpack.c.bf16 %v1346_v26, %v1344_v25 }
 0xed2   :  { %v1004_v36 = vadd.f32 1.0, %v2780_v37  ;;  %v1345_v37 = vld [vmem:[%s3846_s8 + $0x10] sm:$0xff] }
 0xed3   :  { %2562 = vmatprep.subr.bf16.mxu1 %v3450_v14 }
 0xed4   :  { %2781 = vrcp.f32 %v1004_v36  ;;  %v3458_v36 = vpack.c.bf16 %v1345_v37, %v1343_v34 }
 0xede   :  { %v2782_v43 = vpop.eup %2781 }
 0xedf   :  { %v1011_v29 = vmul.f32 %v2782_v43, %v913_v63  ;;  %v1154_v63 = vld [vmem:[%s3845_s6 + $0x40] sm:$0xff] }
 0xee0   :  { %v2555_v20 = vpack.c.bf16 %v1156_v58, %v1154_v63 }
 0xf43   :  { %v1014_v52 = vpop.permute.xlu1 %1013 }
 0xf44   :  { %v1016_v51 = vmul.f32 %v2782_v43, %v1014_v52  ;;  %v1348_v43 = vld [vmem:[%s3846_s8 + $0x28] sm:$0xff]  ;;  %v1350_v52 = vld [vmem:[%s3846_s8 + $0x38] sm:$0xff] }
 0xf46   :  { %1018 = vrot.lane.b32.xlu0 %v1016_v51, %s2902_s0  ;;  %v3469_v51 = vpack.c.bf16 %v1350_v52, %v1348_v43 }
 0xfb8   :  { %v1019_v35 = vpop.permute.xlu0 %1018 }
 0xfb9   :  { %v1021_v31 = vadd.f32 %v1019_v35, %v1011_v29  ;;  %v1347_v29 = vld [vmem:[%s3846_s8 + $0x20] sm:$0xff]  ;;  %v1349_v35 = vld [vmem:[%s3846_s8 + $0x30] sm:$0xff] }
 0xfbb   :  { %2783 = vtanh.f32 %v1021_v31 }
 0xfbc   :  { %2785 = vpow2.f32 %v2347_v32  ;;  %v1354_v32 = vld [vmem:[%s3846_s8 + $0x58] sm:$0xff] }
 0xfc5   :  { %v2784_v53 = vpop.eup %2783 }
 0xfc6   :  { %1024 = vrot.lane.b32.xlu1 %v2784_v53, %s2902_s0  ;;  %v2786_v38 = vpop.eup %2785  ;;  %v1352_v53 = vld [vmem:[%s3846_s8 + $0x48] sm:$0xff] }
 0xfc7   :  { %v1005_v55 = vadd.f32 1.0, %v2786_v38  ;;  %v3487_v38 = vpack.c.bf16 %v1354_v32, %v1352_v53 }
 0xfc9   :  { %2787 = vrcp.f32 %v1005_v55  ;;  %v1351_v55 = vld [vmem:[%s3846_s8 + $0x40] sm:$0xff] }
 0xfd3   :  { %v2788_v44 = vpop.eup %2787 }
0x1038   :  { %v1025_v19 = vpop.permute.xlu1 %1024 }
0x1039   :  { %v1027_v62 = vmul.f32 %v2788_v44, %v1025_v19  ;;  %v1353_v44 = vld [vmem:[%s3846_s8 + $0x50] sm:$0xff] }
0x103a   :  { %v3495_v19 = vpack.c.bf16 %v1353_v44, %v1351_v55 }
0x103b   :  { %1028 = vst.msk [vmem:[#allocation3 + $0x30] sm:$0xff] %vm378_vm4, %v1027_v62  ;;  %2348 = vmatmul.mubr.msk.f32.vlgmr.msra.gmra.mrb[8].mxu1 %vm269_vm1, %v1027_v62 }
0x103c   :  { %1029 = vst.msk [vmem:[#allocation3 + $0x8] sm:$0xff] %vm380_vm5, %v1027_v62  ;;  %1430 = vmatprep.mubr.f32.mxu1 %v2901_v3  ;;  %2564 = vmatpush1.bf16.msra.mxu1 %v3458_v36  ;;  %v1356_v62 = vld [vmem:[%s3846_s8 + $0x68] sm:$0xff] }
0x103d   :  { %2566 = vmatprep.subr.bf16.mxu1 %v3469_v51 }
0x110e   :  { %v1101_v7 = vpop.f32.mrb[8].mxu1 }
0x110f   :  { %v1102_v11 = vadd.f32 %v1101_v7, %v245_v54  ;;  %v1103_v47 = vpop.f32.mrb[9].mxu1  ;;  %v1358_v7 = vld [vmem:[%s3846_s8 + $0x78] sm:$0xff] }
0x1110   :  { %v3390_v0 = vadd.f32 %v1103_v47, %v246_v46  ;;  %v1146_v46 = vld [vmem:[%s3845_s6] sm:$0xff] }
0x1111   :  { %v2349_v17 = vmul.f32 -1.442695, %v1102_v11  ;;  %v2547_v61 = vpack.c.bf16 %v1148_v59, %v1146_v46  ;;  %v3505_v11 = vpack.c.bf16 %v1358_v7, %v1356_v62  ;;  %v1355_v47 = vld [vmem:[%s3846_s8 + $0x60] sm:$0xff]  ;;  %v1140_v59 = vld [vmem:[#allocation3 + $0x10] sm:$0xff] }
0x1112   :  { %2789 = vtanh.f32 %v3390_v0 }
0x1113   :  { %2791 = vpow2.f32 %v2349_v17  ;;  %2548 = vmatpush1.bf16.msra.mxu0 %v2547_v61  ;;  %v1143_v61 = vld [vmem:[#allocation3 + $0x28] sm:$0xff] }
0x1114   :  { %2550 = vmatprep.subr.bf16.mxu0 %v2549_v16  ;;  %v1144_v16 = vld [vmem:[#allocation3 + $0x30] sm:$0xff] }
0x1117   :  { %2552 = vmatpush1.bf16.msra.mxu0 %v2551_v28 }
0x1118   :  { %2554 = vmatprep.subr.bf16.mxu0 %v2553_v24 }
0x111b   :  { %2556 = vmatpush1.bf16.msra.mxu0 %v2555_v20 }
0x111c   :  { %v2790_v9 = vpop.eup %2789  ;;  %2558 = vmatprep.subr.bf16.mxu0 %v2557_v15 }
0x111d   :  { %1121 = vrot.lane.b32.xlu0 %v2790_v9, %s2902_s0  ;;  %v2792_v48 = vpop.eup %2791  ;;  %v1357_v9 = vld [vmem:[%s3846_s8 + $0x70] sm:$0xff] }
0x111e   :  { %v1112_v12 = vadd.f32 1.0, %v2792_v48  ;;  %v3513_v17 = vpack.c.bf16 %v1357_v9, %v1355_v47  ;;  %v1359_v48 = vld [vmem:[%s3847_s9] sm:$0xff] }
0x111f   :  { %2560 = vmatpush1.bf16.msra.mxu0 %v2559_v22 }
0x1120   :  { %2793 = vrcp.f32 %v1112_v12  ;;  %2594 = vmatprep.subr.bf16.mxu0 %v3450_v14  ;;  %v1360_v12 = vld [vmem:[%s3848_s10] sm:$0xff] }
0x112a   :  { %v2794_v39 = vpop.eup %2793 }
0x112b   :  { %v1119_v30 = vmul.f32 %v2794_v39, %v1021_v31  ;;  %v3477_v31 = vpack.c.bf16 %v1349_v35, %v1347_v29 }
0x112d   :  { %2568 = vmatpush1.bf16.msra.mxu1 %v3477_v31 }
0x112e   :  { %2570 = vmatprep.subr.bf16.mxu1 %v3487_v38 }
0x1131   :  { %2572 = vmatpush1.bf16.msra.mxu1 %v3495_v19 }
0x1132   :  { %2574 = vmatprep.subr.bf16.mxu1 %v3505_v11 }
0x1135   :  { %2576 = vmatpush1.bf16.msra.mxu1 %v3513_v17 }
0x1136   :  { %2578 = vmatprep.subr.bf16.mxu1 %v3450_v14 }
0x1138   :  { %2359 = vmatmul.mubr.msk.f32.vlgmr.msra.gmra.mrb[10].mxu1 %vm269_vm1, %v1359_v48 }
0x1139   :  { %2580 = vmatpush1.bf16.msra.mxu1 %v3458_v36  ;;  %1540 = vmatprep.mubr.f32.mxu1 %v2901_v3 }
0x113a   :  { %2582 = vmatprep.subr.bf16.mxu1 %v3469_v51 }
0x113d   :  { %2584 = vmatpush1.bf16.msra.mxu1 %v3477_v31 }
0x113e   :  { %2586 = vmatprep.subr.bf16.mxu1 %v3487_v38 }
0x1141   :  { %2588 = vmatpush1.bf16.msra.mxu1 %v3495_v19 }
0x1142   :  { %2590 = vmatprep.subr.bf16.mxu1 %v3505_v11 }
0x1145   :  { %2592 = vmatpush1.bf16.msra.mxu1 %v3513_v17 }
0x1146   :  { %2610 = vmatprep.subr.bf16.mxu1 %v3450_v14 }
0x118f   :  { %v1122_v40 = vpop.permute.xlu0 %1121 }
0x1190   :  { %v1124_v54 = vmul.f32 %v2794_v39, %v1122_v40  ;;  %v2350_v39 = vmul.f32 -1.442695, %v3390_v0  ;;  %v1139_v0 = vld [vmem:[#allocation3 + $0x8] sm:$0xff] }
0x1192   :  { %1126 = vrot.lane.b32.xlu1 %v1124_v54, %s2902_s0 }
0x1204   :  { %v1127_v33 = vpop.permute.xlu1 %1126 }
0x1205   :  { %v1129_v18 = vadd.f32 %v1127_v33, %v1119_v30  ;;  %v1162_v30 = vld [vmem:[%s3849_s7] sm:$0x3] }
0x1206   :  { %v1167_v56 = vrot.slane %v1162_v30, %v67_v42 }
0x1207   :  { %2795 = vtanh.f32 %v1129_v18  ;;  %v1171_v18 = vrot.slane %v1162_v30, %v71_v45 }
0x1208   :  { %2797 = vpow2.f32 %v2350_v39 }
0x120b   :  { %v1432_v23 = vpop.f32.mrb[10].mxu1 }
0x120c   :  { %v1434_v28 = vpop.f32.mrb[11].mxu1 }
0x1211   :  { %v2796_v8 = vpop.eup %2795 }
0x1212   :  { %1132 = vrot.lane.b32.xlu0 %v2796_v8, %s2902_s0  ;;  %v2798_v40 = vpop.eup %2797 }
0x1213   :  { %v1113_v54 = vadd.f32 1.0, %v2798_v40 }
0x1215   :  { %2799 = vrcp.f32 %v1113_v54 }
0x1216   :  { %1451 = vrot.lane.b32.xlu0 %v1360_v12, %s2902_s0 }
0x121f   :  { %v2800_v49 = vpop.eup %2799 }
0x1284   :  { %v1133_v50 = vpop.permute.xlu0 %1132 }
0x1285   :  { %v1135_v46 = vmul.f32 %v2800_v49, %v1133_v50 }
0x1287   :  { %1136 = vst.msk [vmem:[#allocation3 + $0x38] sm:$0xff] %vm378_vm4, %v1135_v46 }
0x1288   :  { %1137 = vst.msk [vmem:[#allocation3] sm:$0xff] %vm380_vm5, %v1135_v46 }
0x128e   :  { %v1145_v21 = vld [vmem:[#allocation3 + $0x38] sm:$0xff] }
0x128f   :  { %v1138_v57 = vld [vmem:[#allocation3] sm:$0xff] }
0x1290   :  { %2351 = vmatmul.mubr.msk.f32.vlgmr.msra.gmra.mrb[22].mxu0 %vm269_vm1, %v1138_v57 }
0x1291   :  { %1268 = vmatprep.mubr.f32.mxu0 %v2901_v3  ;;  %2596 = vmatpush1.bf16.msra.mxu0 %v3458_v36 }
0x1292   :  { %2598 = vmatprep.subr.bf16.mxu0 %v3469_v51 }
0x1294   :  { %2352 = vmatmul.mubr.msk.f32.gmra.mrb[24].mxu0 %vm269_vm1, %v1139_v0 }
0x1295   :  { %1274 = vmatprep.mubr.f32.mxu0 %v2901_v3  ;;  %2600 = vmatpush1.bf16.msra.mxu0 %v3477_v31 }
0x1296   :  { %2602 = vmatprep.subr.bf16.mxu0 %v3487_v38 }
0x1298   :  { %2353 = vmatmul.mubr.msk.f32.gmra.mrb[26].mxu0 %vm269_vm1, %v1140_v59 }
0x1299   :  { %1280 = vmatprep.mubr.f32.mxu0 %v2901_v3  ;;  %2604 = vmatpush1.bf16.msra.mxu0 %v3495_v19 }
0x129a   :  { %2606 = vmatprep.subr.bf16.mxu0 %v3505_v11 }
0x129c   :  { %2354 = vmatmul.mubr.msk.f32.gmra.mrb[28].mxu0 %vm269_vm1, %v1141_v60 }
0x129d   :  { %1286 = vmatprep.mubr.f32.mxu0 %v2901_v3  ;;  %2608 = vmatpush1.bf16.msra.mxu0 %v3513_v17 }
0x129e   :  { %2626 = vmatprep.subr.bf16.mxu0 %v3450_v14 }
0x12a0   :  { %2355 = vmatmul.mubr.msk.f32.gmra.mrb[30].mxu0 %vm269_vm1, %v1142_v13 }
0x12a1   :  { %1292 = vmatprep.mubr.f32.mxu0 %v2901_v3 }
0x12a4   :  { %2356 = vmatmul.mubr.msk.f32.gmra.mrb[32].mxu0 %vm269_vm1, %v1143_v61 }
0x12a5   :  { %1298 = vmatprep.mubr.f32.mxu0 %v2901_v3 }
0x12a8   :  { %2357 = vmatmul.mubr.msk.f32.gmra.mrb[34].mxu0 %vm269_vm1, %v1144_v16 }
0x12a9   :  { %1304 = vmatprep.mubr.f32.mxu0 %v2901_v3 }
0x12ac   :  { %2358 = vmatmul.mubr.msk.f32.gmra.mrb[36].mxu0 %vm269_vm1, %v1145_v21 }
0x12ad   :  { %1646 = vmatprep.mubr.f32.mxu0 %v2901_v3 }
0x1363   :  { %v1264_v33 = vpop.f32.mrb[22].mxu0 }
0x1364   :  { %v1266_v10 = vpop.f32.mrb[23].mxu0  ;;  %v3641_v46 = vadd.f32 %v1264_v33, %v1167_v56 }
0x1365   :  { %v3645_v59 = vadd.f32 %v1266_v10, %v1171_v18 }
0x1367   :  { %v1270_v24 = vpop.f32.mrb[24].mxu0 }
0x1368   :  { %v3569_v63 = vadd.f32 %v1270_v24, %v1167_v56  ;;  %v1272_v58 = vpop.f32.mrb[25].mxu0 }
0x1369   :  { %v3571_v20 = vadd.f32 %v1272_v58, %v1171_v18 }
0x136b   :  { %v1276_v27 = vpop.f32.mrb[26].mxu0 }
0x136c   :  { %v3573_v1 = vadd.f32 %v1276_v27, %v1167_v56  ;;  %v1278_v4 = vpop.f32.mrb[27].mxu0 }
0x136d   :  { %v3575_v15 = vadd.f32 %v1278_v4, %v1171_v18  ;;  %v1452_v4 = vpop.permute.xlu0 %1451 }
0x136f   :  { %v1282_v5 = vpop.f32.mrb[28].mxu0 }
0x1370   :  { %v3577_v22 = vadd.f32 %v1282_v5, %v1167_v56  ;;  %v1284_v8 = vpop.f32.mrb[29].mxu0 }
0x1371   :  { %v3579_v42 = vadd.f32 %v1284_v8, %v1171_v18 }
0x1373   :  { %v1288_v41 = vpop.f32.mrb[30].mxu0 }
0x1374   :  { %v3581_v45 = vadd.f32 %v1288_v41, %v1167_v56  ;;  %v1290_v25 = vpop.f32.mrb[31].mxu0 }
0x1375   :  { %v3583_v26 = vadd.f32 %v1290_v25, %v1171_v18 }
0x1376   :  { %v1323_v34 = vsel %vm3147_vm2, %v3577_v22, %v3581_v45  ;;  %v1327_v37 = vsel %vm3147_vm2, %v3581_v45, %v3577_v22 }
0x1377   :  { %v1294_v43 = vpop.f32.mrb[32].mxu0  ;;  %v1324_v52 = vsel %vm3151_vm3, %v3579_v42, %v3583_v26  ;;  %v1328_v29 = vsel %vm3151_vm3, %v3583_v26, %v3579_v42 }
0x1378   :  { %v3601_v35 = vadd.f32 %v1294_v43, %v1167_v56  ;;  %v1296_v53 = vpop.f32.mrb[33].mxu0 }
0x1379   :  { %v3603_v32 = vadd.f32 %v1296_v53, %v1171_v18 }
0x137a   :  { %v1319_v55 = vsel %vm3147_vm2, %v3573_v1, %v3601_v35  ;;  %v1331_v44 = vsel %vm3147_vm2, %v3601_v35, %v3573_v1 }
0x137b   :  { %v1300_v62 = vpop.f32.mrb[34].mxu0  ;;  %v1320_v7 = vsel %vm3151_vm3, %v3575_v15, %v3603_v32  ;;  %v1332_v47 = vsel %vm3151_vm3, %v3603_v32, %v3575_v15 }
0x137c   :  { %v3621_v9 = vadd.f32 %v1300_v62, %v1167_v56  ;;  %v1302_v48 = vpop.f32.mrb[35].mxu0 }
0x137d   :  { %v3623_v12 = vadd.f32 %v1302_v48, %v1171_v18 }
0x137e   :  { %v1315_v39 = vsel %vm3147_vm2, %v3569_v63, %v3621_v9  ;;  %v1335_v40 = vsel %vm3147_vm2, %v3621_v9, %v3569_v63 }
0x137f   :  { %v1306_v54 = vpop.f32.mrb[36].mxu0  ;;  %v1316_v49 = vsel %vm3151_vm3, %v3571_v20, %v3623_v12  ;;  %v1336_v50 = vsel %vm3151_vm3, %v3623_v12, %v3571_v20 }
0x1380   :  { %v3643_v57 = vadd.f32 %v1306_v54, %v1167_v56  ;;  %v1308_v0 = vpop.f32.mrb[37].mxu0 }
0x1381   :  { %v3647_v60 = vadd.f32 %v1308_v0, %v1171_v18 }
0x1382   :  { %v1311_v13 = vsel %vm3147_vm2, %v3641_v46, %v3643_v57  ;;  %v1339_v61 = vsel %vm3147_vm2, %v3643_v57, %v3641_v46  ;;  %v2903_v57 = vmov 0.0|0.0  }
0x1383   :  { %v1433_v16 = vadd.f32 %v1432_v23, %v1311_v13  ;;  %v1312_v21 = vsel %vm3151_vm3, %v3645_v59, %v3647_v60  ;;  %v1340_v30 = vsel %vm3151_vm3, %v3647_v60, %v3645_v59  ;;  %v2215_v59 = vld [vmem:[%s3850_s11 + $0x8] sm:$0xff]  ;;  %v2216_v60 = vld [vmem:[%s3850_s11 + $0x10] sm:$0xff] }
0x1384   :  { %v1435_v33 = vadd.f32 %v1434_v28, %v1312_v21 }
0x1385   :  { %v2360_v56 = vmul.f32 -1.442695, %v1433_v16 }
0x1386   :  { %2801 = vtanh.f32 %v1435_v33  ;;  %v2361_v25 = vmul.f32 -1.442695, %v1435_v33 }
0x1387   :  { %2803 = vpow2.f32 %v2360_v56 }
0x1390   :  { %v2802_v10 = vpop.eup %2801 }
0x1391   :  { %1456 = vrot.lane.b32.xlu1 %v2802_v10, %s2902_s0  ;;  %v2804_v18 = vpop.eup %2803 }
0x1392   :  { %v1443_v24 = vadd.f32 1.0, %v2804_v18 }
0x1394   :  { %2805 = vrcp.f32 %v1443_v24 }
0x139e   :  { %v2806_v23 = vpop.eup %2805 }
0x139f   :  { %v1454_v5 = vmul.f32 %v2806_v23, %v1452_v4 }
0x1403   :  { %v1457_v58 = vpop.permute.xlu1 %1456 }
0x1404   :  { %v1459_v27 = vmul.f32 %v2806_v23, %v1457_v58 }
0x1406   :  { %1461 = vrot.lane.b32.xlu1 %v1459_v27, %s2902_s0 }
0x1478   :  { %v1462_v8 = vpop.permute.xlu1 %1461 }
0x1479   :  { %v1464_v41 = vadd.f32 %v1462_v8, %v1454_v5 }
0x147b   :  { %2807 = vtanh.f32 %v1464_v41 }
0x147c   :  { %2809 = vpow2.f32 %v2361_v25 }
0x1485   :  { %v2808_v28 = vpop.eup %2807 }
0x1486   :  { %1467 = vrot.lane.b32.xlu0 %v2808_v28, %s2902_s0  ;;  %v2810_v43 = vpop.eup %2809 }
0x1487   :  { %v1444_v53 = vadd.f32 1.0, %v2810_v43 }
0x1489   :  { %2811 = vrcp.f32 %v1444_v53 }
0x1493   :  { %v2812_v62 = vpop.eup %2811 }
0x14f8   :  { %v1468_v48 = vpop.permute.xlu0 %1467 }
0x14f9   :  { %v3668_v54 = vmul.f32 %v2812_v62, %v1468_v48 }
0x14fb   :  { %2362 = vmatmul.mubr.msk.f32.vlgmr.msra.gmra.mrb[12].mxu1 %vm269_vm1, %v3668_v54 }
0x14fc   :  { %2612 = vmatpush1.bf16.msra.mxu1 %v3458_v36  ;;  %1752 = vmatprep.mubr.f32.mxu1 %v2901_v3 }
0x14fd   :  { %2614 = vmatprep.subr.bf16.mxu1 %v3469_v51 }
0x1500   :  { %2616 = vmatpush1.bf16.msra.mxu1 %v3477_v31 }
0x1501   :  { %2618 = vmatprep.subr.bf16.mxu1 %v3487_v38 }
0x1504   :  { %2620 = vmatpush1.bf16.msra.mxu1 %v3495_v19 }
0x1505   :  { %2622 = vmatprep.subr.bf16.mxu1 %v3505_v11 }
0x1508   :  { %2624 = vmatpush1.bf16.msra.mxu1 %v3513_v17 }
0x1509   :  { %2642 = vmatprep.subr.bf16.mxu1 %v3450_v14 }
0x15ce   :  { %v1542_v0 = vpop.f32.mrb[12].mxu1 }
0x15cf   :  { %v1543_v13 = vadd.f32 %v1542_v0, %v1315_v39  ;;  %v1544_v16 = vpop.f32.mrb[13].mxu1 }
0x15d0   :  { %v1545_v21 = vadd.f32 %v1544_v16, %v1316_v49 }
0x15d1   :  { %v2363_v10 = vmul.f32 -1.442695, %v1543_v13 }
0x15d2   :  { %2813 = vtanh.f32 %v1545_v21  ;;  %v2364_v49 = vmul.f32 -1.442695, %v1545_v21 }
0x15d3   :  { %2815 = vpow2.f32 %v2363_v10 }
0x15dc   :  { %v2814_v33 = vpop.eup %2813 }
0x15dd   :  { %1562 = vrot.lane.b32.xlu1 %v2814_v33, %s2902_s0  ;;  %v2816_v56 = vpop.eup %2815 }
0x15de   :  { %v1553_v18 = vadd.f32 1.0, %v2816_v56 }
0x15e0   :  { %2817 = vrcp.f32 %v1553_v18 }
0x15ea   :  { %v2818_v24 = vpop.eup %2817 }
0x15eb   :  { %v1560_v27 = vmul.f32 %v2818_v24, %v1464_v41 }
0x164f   :  { %v1563_v23 = vpop.permute.xlu1 %1562 }
0x1650   :  { %v1565_v58 = vmul.f32 %v2818_v24, %v1563_v23 }
0x1652   :  { %1567 = vrot.lane.b32.xlu0 %v1565_v58, %s2902_s0 }
0x16c4   :  { %v1568_v4 = vpop.permute.xlu0 %1567 }
0x16c5   :  { %v1570_v5 = vadd.f32 %v1568_v4, %v1560_v27 }
0x16c7   :  { %2819 = vtanh.f32 %v1570_v5 }
0x16c8   :  { %2821 = vpow2.f32 %v2364_v49 }
0x16d1   :  { %v2820_v39 = vpop.eup %2819 }
0x16d2   :  { %1573 = vrot.lane.b32.xlu1 %v2820_v39, %s2902_s0  ;;  %v2822_v8 = vpop.eup %2821 }
0x16d3   :  { %v1554_v28 = vadd.f32 1.0, %v2822_v8 }
0x16d5   :  { %2823 = vrcp.f32 %v1554_v28 }
0x16df   :  { %v2824_v25 = vpop.eup %2823 }
0x1744   :  { %v1574_v43 = vpop.permute.xlu1 %1573 }
0x1745   :  { %v1576_v53 = vmul.f32 %v2824_v25, %v1574_v43 }
0x1747   :  { %2365 = vmatmul.mubr.msk.f32.vlgmr.msra.gmra.mrb[38].mxu0 %vm269_vm1, %v1576_v53 }
0x1748   :  { %2628 = vmatpush1.bf16.msra.mxu0 %v3458_v36  ;;  %1858 = vmatprep.mubr.f32.mxu0 %v2901_v3 }
0x1749   :  { %2630 = vmatprep.subr.bf16.mxu0 %v3469_v51 }
0x174c   :  { %2632 = vmatpush1.bf16.msra.mxu0 %v3477_v31 }
0x174d   :  { %2634 = vmatprep.subr.bf16.mxu0 %v3487_v38 }
0x1750   :  { %2636 = vmatpush1.bf16.msra.mxu0 %v3495_v19 }
0x1751   :  { %2638 = vmatprep.subr.bf16.mxu0 %v3505_v11 }
0x1754   :  { %2640 = vmatpush1.bf16.msra.mxu0 %v3513_v17 }
0x1755   :  { %2658 = vmatprep.subr.bf16.mxu0 %v3450_v14 }
0x181a   :  { %v1648_v41 = vpop.f32.mrb[38].mxu0 }
0x181b   :  { %v1649_v62 = vadd.f32 %v1648_v41, %v1319_v55  ;;  %v1650_v48 = vpop.f32.mrb[39].mxu0 }
0x181c   :  { %v1651_v0 = vadd.f32 %v1650_v48, %v1320_v7 }
0x181d   :  { %v2366_v16 = vmul.f32 -1.442695, %v1649_v62 }
0x181e   :  { %2825 = vtanh.f32 %v1651_v0  ;;  %v2367_v7 = vmul.f32 -1.442695, %v1651_v0 }
0x181f   :  { %2827 = vpow2.f32 %v2366_v16 }
0x1828   :  { %v2826_v13 = vpop.eup %2825 }
0x1829   :  { %1668 = vrot.lane.b32.xlu0 %v2826_v13, %s2902_s0  ;;  %v2828_v21 = vpop.eup %2827 }
0x182a   :  { %v1659_v33 = vadd.f32 1.0, %v2828_v21 }
0x182c   :  { %2829 = vrcp.f32 %v1659_v33 }
0x1836   :  { %v2830_v10 = vpop.eup %2829 }
0x1837   :  { %v1666_v55 = vmul.f32 %v2830_v10, %v1570_v5 }
0x189b   :  { %v1669_v56 = vpop.permute.xlu0 %1668 }
0x189c   :  { %v1671_v18 = vmul.f32 %v2830_v10, %v1669_v56 }
0x189e   :  { %1673 = vrot.lane.b32.xlu1 %v1671_v18, %s2902_s0 }
0x1910   :  { %v1674_v24 = vpop.permute.xlu1 %1673 }
0x1911   :  { %v1676_v23 = vadd.f32 %v1674_v24, %v1666_v55 }
0x1913   :  { %2831 = vtanh.f32 %v1676_v23 }
0x1914   :  { %2833 = vpow2.f32 %v2367_v7 }
0x191d   :  { %v2832_v58 = vpop.eup %2831 }
0x191e   :  { %1679 = vrot.lane.b32.xlu0 %v2832_v58, %s2902_s0  ;;  %v2834_v27 = vpop.eup %2833 }
0x191f   :  { %v1660_v4 = vadd.f32 1.0, %v2834_v27 }
0x1921   :  { %2835 = vrcp.f32 %v1660_v4 }
0x192b   :  { %v2836_v39 = vpop.eup %2835 }
0x1990   :  { %v1680_v49 = vpop.permute.xlu0 %1679 }
0x1991   :  { %v1682_v8 = vmul.f32 %v2836_v39, %v1680_v49 }
0x1993   :  { %2368 = vmatmul.mubr.msk.f32.vlgmr.msra.gmra.mrb[14].mxu1 %vm269_vm1, %v1682_v8 }
0x1994   :  { %2644 = vmatpush1.bf16.msra.mxu1 %v3458_v36  ;;  %1964 = vmatprep.mubr.f32.mxu1 %v2901_v3 }
0x1995   :  { %2646 = vmatprep.subr.bf16.mxu1 %v3469_v51 }
0x1998   :  { %2648 = vmatpush1.bf16.msra.mxu1 %v3477_v31 }
0x1999   :  { %2650 = vmatprep.subr.bf16.mxu1 %v3487_v38 }
0x199c   :  { %2652 = vmatpush1.bf16.msra.mxu1 %v3495_v19 }
0x199d   :  { %2654 = vmatprep.subr.bf16.mxu1 %v3505_v11 }
0x19a0   :  { %2656 = vmatpush1.bf16.msra.mxu1 %v3513_v17 }
0x19a1   :  { %2674 = vmatprep.subr.bf16.mxu1 %v3450_v14 }
0x1a66   :  { %v1754_v5 = vpop.f32.mrb[14].mxu1 }
0x1a67   :  { %v1755_v28 = vadd.f32 %v1754_v5, %v1323_v34  ;;  %v1756_v25 = vpop.f32.mrb[15].mxu1 }
0x1a68   :  { %v1757_v43 = vadd.f32 %v1756_v25, %v1324_v52 }
0x1a69   :  { %v2369_v41 = vmul.f32 -1.442695, %v1755_v28 }
0x1a6a   :  { %2837 = vtanh.f32 %v1757_v43  ;;  %v2370_v52 = vmul.f32 -1.442695, %v1757_v43 }
0x1a6b   :  { %2839 = vpow2.f32 %v2369_v41 }
0x1a74   :  { %v2838_v53 = vpop.eup %2837 }
0x1a75   :  { %1774 = vrot.lane.b32.xlu1 %v2838_v53, %s2902_s0  ;;  %v2840_v14 = vpop.eup %2839 }
0x1a76   :  { %v1765_v62 = vadd.f32 1.0, %v2840_v14 }
0x1a78   :  { %2841 = vrcp.f32 %v1765_v62 }
0x1a82   :  { %v2842_v48 = vpop.eup %2841 }
0x1a83   :  { %v1772_v34 = vmul.f32 %v2842_v48, %v1676_v23 }
0x1ae7   :  { %v1775_v0 = vpop.permute.xlu1 %1774 }
0x1ae8   :  { %v1777_v13 = vmul.f32 %v2842_v48, %v1775_v0 }
0x1aea   :  { %1779 = vrot.lane.b32.xlu0 %v1777_v13, %s2902_s0 }
0x1b5c   :  { %v1780_v16 = vpop.permute.xlu0 %1779 }
0x1b5d   :  { %v1782_v21 = vadd.f32 %v1780_v16, %v1772_v34 }
0x1b5f   :  { %2843 = vtanh.f32 %v1782_v21 }
0x1b60   :  { %2845 = vpow2.f32 %v2370_v52 }
0x1b69   :  { %v2844_v33 = vpop.eup %2843 }
0x1b6a   :  { %1785 = vrot.lane.b32.xlu1 %v2844_v33, %s2902_s0  ;;  %v2846_v10 = vpop.eup %2845 }
0x1b6b   :  { %v1766_v56 = vadd.f32 1.0, %v2846_v10 }
0x1b6d   :  { %2847 = vrcp.f32 %v1766_v56 }
0x1b77   :  { %v2848_v18 = vpop.eup %2847 }
0x1bdc   :  { %v1786_v55 = vpop.permute.xlu1 %1785 }
0x1bdd   :  { %v1788_v24 = vmul.f32 %v2848_v18, %v1786_v55 }
0x1bdf   :  { %2371 = vmatmul.mubr.msk.f32.vlgmr.msra.gmra.mrb[40].mxu0 %vm269_vm1, %v1788_v24 }
0x1be0   :  { %2660 = vmatpush1.bf16.msra.mxu0 %v3458_v36  ;;  %2070 = vmatprep.mubr.f32.mxu0 %v2901_v3 }
0x1be1   :  { %2662 = vmatprep.subr.bf16.mxu0 %v3469_v51 }
0x1be4   :  { %2664 = vmatpush1.bf16.msra.mxu0 %v3477_v31 }
0x1be5   :  { %2666 = vmatprep.subr.bf16.mxu0 %v3487_v38 }
0x1be8   :  { %2668 = vmatpush1.bf16.msra.mxu0 %v3495_v19 }
0x1be9   :  { %2670 = vmatprep.subr.bf16.mxu0 %v3505_v11 }
0x1bec   :  { %2672 = vmatpush1.bf16.msra.mxu0 %v3513_v17 }
0x1bed   :  { %2689 = vmatprep.subr.bf16.mxu0 %v2903_v57 }
0x1cb2   :  { %v1860_v23 = vpop.f32.mrb[40].mxu0 }
0x1cb3   :  { %v1861_v58 = vadd.f32 %v1860_v23, %v1327_v37  ;;  %v1862_v7 = vpop.f32.mrb[41].mxu0 }
0x1cb4   :  { %v1863_v27 = vadd.f32 %v1862_v7, %v1328_v29 }
0x1cb5   :  { %v2372_v39 = vmul.f32 -1.442695, %v1861_v58 }
0x1cb6   :  { %2849 = vtanh.f32 %v1863_v27  ;;  %v2373_v26 = vmul.f32 -1.442695, %v1863_v27 }
0x1cb7   :  { %2851 = vpow2.f32 %v2372_v39 }
0x1cc0   :  { %v2850_v4 = vpop.eup %2849 }
0x1cc1   :  { %1880 = vrot.lane.b32.xlu0 %v2850_v4, %s2902_s0  ;;  %v2852_v49 = vpop.eup %2851 }
0x1cc2   :  { %v1871_v8 = vadd.f32 1.0, %v2852_v49 }
0x1cc4   :  { %2853 = vrcp.f32 %v1871_v8 }
0x1cce   :  { %v2854_v5 = vpop.eup %2853 }
0x1ccf   :  { %v1878_v45 = vmul.f32 %v2854_v5, %v1782_v21 }
0x1d33   :  { %v1881_v28 = vpop.permute.xlu0 %1880 }
0x1d34   :  { %v1883_v22 = vmul.f32 %v2854_v5, %v1881_v28 }
0x1d36   :  { %1885 = vrot.lane.b32.xlu1 %v1883_v22, %s2902_s0 }
0x1da8   :  { %v1886_v37 = vpop.permute.xlu1 %1885 }
0x1da9   :  { %v1888_v25 = vadd.f32 %v1886_v37, %v1878_v45 }
0x1dab   :  { %2855 = vtanh.f32 %v1888_v25 }
0x1dac   :  { %2857 = vpow2.f32 %v2373_v26 }
0x1db5   :  { %v2856_v42 = vpop.eup %2855 }
0x1db6   :  { %1891 = vrot.lane.b32.xlu0 %v2856_v42, %s2902_s0  ;;  %v2858_v29 = vpop.eup %2857 }
0x1db7   :  { %v1872_v43 = vadd.f32 1.0, %v2858_v29 }
0x1db9   :  { %2859 = vrcp.f32 %v1872_v43 }
0x1dc3   :  { %v2860_v53 = vpop.eup %2859 }
0x1e28   :  { %v1892_v41 = vpop.permute.xlu0 %1891 }
0x1e29   :  { %v1894_v14 = vmul.f32 %v2860_v53, %v1892_v41  ;;  %v2218_v41 = vld [vmem:[%s3850_s11 + $0x20] sm:$0xff] }
0x1e2b   :  { %2374 = vmatmul.mubr.msk.f32.vlgmr.msra.gmra.mrb[16].mxu1 %vm269_vm1, %v1894_v14  ;;  %v2219_v14 = vld [vmem:[%s3850_s11 + $0x28] sm:$0xff] }
0x1e2c   :  { %2676 = vmatpush1.bf16.msra.mxu1 %v3458_v36  ;;  %2176 = vmatprep.mubr.f32.mxu1 %v2901_v3 }
0x1e2d   :  { %2678 = vmatprep.subr.bf16.mxu1 %v3469_v51 }
0x1e30   :  { %2680 = vmatpush1.bf16.msra.mxu1 %v3477_v31 }
0x1e31   :  { %2682 = vmatprep.subr.bf16.mxu1 %v3487_v38 }
0x1e34   :  { %2684 = vmatpush1.bf16.msra.mxu1 %v3495_v19 }
0x1e35   :  { %2686 = vmatprep.subr.bf16.mxu1 %v3505_v11 }
0x1e38   :  { %2688 = vmatpush1.bf16.msra.mxu1 %v3513_v17 }
0x1efe   :  { %v1966_v62 = vpop.f32.mrb[16].mxu1 }
0x1eff   :  { %v1967_v36 = vadd.f32 %v1966_v62, %v1331_v44  ;;  %v1968_v48 = vpop.f32.mrb[17].mxu1  ;;  %v2696_v62 = vpack.c.bf16 %v2219_v14, %v2218_v41 }
0x1f00   :  { %v1969_v51 = vadd.f32 %v1968_v48, %v1332_v47  ;;  %v2221_v48 = vld [vmem:[%s3850_s11 + $0x38] sm:$0xff] }
0x1f01   :  { %v2375_v38 = vmul.f32 -1.442695, %v1967_v36  ;;  %v2220_v36 = vld [vmem:[%s3850_s11 + $0x30] sm:$0xff] }
0x1f02   :  { %2861 = vtanh.f32 %v1969_v51  ;;  %v2376_v32 = vmul.f32 -1.442695, %v1969_v51 }
0x1f03   :  { %2863 = vpow2.f32 %v2375_v38 }
0x1f0c   :  { %v2862_v31 = vpop.eup %2861 }
0x1f0d   :  { %1986 = vrot.lane.b32.xlu1 %v2862_v31, %s2902_s0  ;;  %v2864_v19 = vpop.eup %2863  ;;  %v2699_v31 = vpack.c.bf16 %v2221_v48, %v2220_v36 }
0x1f0e   :  { %v1977_v11 = vadd.f32 1.0, %v2864_v19 }
0x1f10   :  { %2865 = vrcp.f32 %v1977_v11 }
0x1f1a   :  { %v2866_v17 = vpop.eup %2865 }
0x1f1b   :  { %v1984_v35 = vmul.f32 %v2866_v17, %v1888_v25 }
0x1f7f   :  { %v1987_v0 = vpop.permute.xlu1 %1986 }
0x1f80   :  { %v1989_v1 = vmul.f32 %v2866_v17, %v1987_v0 }
0x1f82   :  { %1991 = vrot.lane.b32.xlu0 %v1989_v1, %s2902_s0 }
0x1ff4   :  { %v1992_v44 = vpop.permute.xlu0 %1991 }
0x1ff5   :  { %v1994_v13 = vadd.f32 %v1992_v44, %v1984_v35 }
0x1ff7   :  { %2867 = vtanh.f32 %v1994_v13 }
0x1ff8   :  { %2869 = vpow2.f32 %v2376_v32 }
0x2001   :  { %v2868_v15 = vpop.eup %2867 }
0x2002   :  { %1997 = vrot.lane.b32.xlu1 %v2868_v15, %s2902_s0  ;;  %v2870_v47 = vpop.eup %2869 }
0x2003   :  { %v1978_v34 = vadd.f32 1.0, %v2870_v47 }
0x2005   :  { %2871 = vrcp.f32 %v1978_v34 }
0x200f   :  { %v2872_v16 = vpop.eup %2871 }
0x2074   :  { %v1998_v21 = vpop.permute.xlu1 %1997 }
0x2075   :  { %v2000_v33 = vmul.f32 %v2872_v16, %v1998_v21 }
0x2077   :  { %2377 = vmatmul.mubr.msk.f32.vlgmr.msra.gmra.mrb[42].mxu0 %vm269_vm1, %v2000_v33 }
0x2078   :  { %2410 = vmatprep.mubr.msk.f32.mxu0 %vm2904_vm6, %v2901_v3  ;;  %v2383_v3 = vld [vmem:[%s3851_s12] ss:$0 sm:$0xff] }
0x214a   :  { %v2072_v52 = vpop.f32.mrb[42].mxu0 }
0x214b   :  { %v2073_v10 = vadd.f32 %v2072_v52, %v1335_v40  ;;  %v2074_v56 = vpop.f32.mrb[43].mxu0 }
0x214c   :  { %v2075_v18 = vadd.f32 %v2074_v56, %v1336_v50 }
0x214d   :  { %v2378_v24 = vmul.f32 -1.442695, %v2073_v10 }
0x214e   :  { %2873 = vtanh.f32 %v2075_v18  ;;  %v2379_v12 = vmul.f32 -1.442695, %v2075_v18 }
0x214f   :  { %2875 = vpow2.f32 %v2378_v24 }
0x2158   :  { %v2874_v55 = vpop.eup %2873 }
0x2159   :  { %2092 = vrot.lane.b32.xlu0 %v2874_v55, %s2902_s0  ;;  %v2876_v23 = vpop.eup %2875 }
0x215a   :  { %v2083_v58 = vadd.f32 1.0, %v2876_v23 }
0x215c   :  { %2877 = vrcp.f32 %v2083_v58 }
0x2166   :  { %v2878_v7 = vpop.eup %2877 }
0x2167   :  { %v2090_v9 = vmul.f32 %v2878_v7, %v1994_v13 }
0x21cb   :  { %v2093_v27 = vpop.permute.xlu0 %2092 }
0x21cc   :  { %v2095_v63 = vmul.f32 %v2878_v7, %v2093_v27 }
0x21ce   :  { %2097 = vrot.lane.b32.xlu1 %v2095_v63, %s2902_s0 }
0x2240   :  { %v2098_v40 = vpop.permute.xlu1 %2097 }
0x2241   :  { %v2100_v4 = vadd.f32 %v2098_v40, %v2090_v9 }
0x2243   :  { %2879 = vtanh.f32 %v2100_v4 }
0x2244   :  { %2881 = vpow2.f32 %v2379_v12 }
0x224d   :  { %v2880_v20 = vpop.eup %2879 }
0x224e   :  { %2103 = vrot.lane.b32.xlu0 %v2880_v20, %s2902_s0  ;;  %v2882_v50 = vpop.eup %2881 }
0x224f   :  { %v2084_v39 = vadd.f32 1.0, %v2882_v50 }
0x2251   :  { %2883 = vrcp.f32 %v2084_v39 }
0x225b   :  { %v2884_v49 = vpop.eup %2883 }
0x22c0   :  { %v2104_v8 = vpop.permute.xlu0 %2103 }
0x22c1   :  { %v2106_v5 = vmul.f32 %v2884_v49, %v2104_v8 }
0x22c3   :  { %2380 = vmatmul.mubr.msk.f32.vlgmr.msra.gmra.mrb[18].mxu1 %vm269_vm1, %v2106_v5 }
0x2396   :  { %v2178_v28 = vpop.f32.mrb[18].mxu1 }
0x2397   :  { %v2179_v22 = vadd.f32 %v2178_v28, %v1339_v61  ;;  %v2180_v45 = vpop.f32.mrb[19].mxu1  ;;  %v2690_v61 = vpack.c.bf16 %v2215_v59, %v2214_v6 }
0x2398   :  { %v2181_v37 = vadd.f32 %v2180_v45, %v1340_v30  ;;  %v2217_v30 = vld [vmem:[%s3850_s11 + $0x18] sm:$0xff] }
0x2399   :  { %v2381_v42 = vmul.f32 -1.442695, %v2179_v22  ;;  %2691 = vmatpush3.bf16.msra.mxu0 %v2690_v61  ;;  %v2693_v53 = vpack.c.bf16 %v2217_v30, %v2216_v60 }
0x239a   :  { %2885 = vtanh.f32 %v2181_v37  ;;  %2692 = vmatprep.subr.bf16.mxu0 %v2903_v57  ;;  %v2382_v17 = vmul.f32 -1.442695, %v2181_v37 }
0x239b   :  { %2887 = vpow2.f32 %v2381_v42 }
0x239d   :  { %2694 = vmatpush3.bf16.msra.mxu0 %v2693_v53 }
0x239e   :  { %2695 = vmatprep.subr.bf16.mxu0 %v2903_v57 }
0x23a1   :  { %2697 = vmatpush3.bf16.msra.mxu0 %v2696_v62 }
0x23a2   :  { %2698 = vmatprep.subr.bf16.mxu0 %v2903_v57 }
0x23a4   :  { %v2886_v25 = vpop.eup %2885 }
0x23a5   :  { %2198 = vrot.lane.b32.xlu1 %v2886_v25, %s2902_s0  ;;  %v2888_v26 = vpop.eup %2887  ;;  %2700 = vmatpush3.bf16.msra.mxu0 %v2699_v31 }
0x23a6   :  { %v2189_v29 = vadd.f32 1.0, %v2888_v26 }
0x23a8   :  { %2889 = vrcp.f32 %v2189_v29 }
0x23b2   :  { %v2890_v2 = vpop.eup %2889 }
0x23b3   :  { %v2196_v51 = vmul.f32 %v2890_v2, %v2100_v4 }
0x2417   :  { %v2199_v43 = vpop.permute.xlu1 %2198 }
0x2418   :  { %v2201_v46 = vmul.f32 %v2890_v2, %v2199_v43 }
0x241a   :  { %2203 = vrot.lane.b32.xlu0 %v2201_v46, %s2902_s0 }
0x248c   :  { %v2204_v38 = vpop.permute.xlu0 %2203 }
0x248d   :  { %v2206_v19 = vadd.f32 %v2204_v38, %v2196_v51 }
0x248f   :  { %2891 = vtanh.f32 %v2206_v19 }
0x2490   :  { %2893 = vpow2.f32 %v2382_v17 }
0x2499   :  { %v2892_v11 = vpop.eup %2891 }
0x249a   :  { %2209 = vrot.lane.b32.xlu1 %v2892_v11, %s2902_s0  ;;  %v2894_v0 = vpop.eup %2893 }
0x249b   :  { %v2190_v1 = vadd.f32 1.0, %v2894_v0 }
0x249d   :  { %2895 = vrcp.f32 %v2190_v1 }
0x24a7   :  { %v2896_v35 = vpop.eup %2895 }
0x250c   :  { %v2210_v44 = vpop.permute.xlu1 %2209 }
0x250d   :  { %v2212_v13 = vmul.f32 %v2896_v35, %v2210_v44 }
0x250f   :  { %v2213_v15 = vsel %vm378_vm4, %v2212_v13, %v3668_v54 }
0x2510   :  { %2411 = vmatmul.mubr.msk.f32.vlgmr.msra.gmra.mrb[44].mxu0 %vm269_vm1, %v2213_v15 }
0x25e3   :  { %v2298_v32 = vpop.f32.mrb[44].mxu0 }
0x25e4   :  { %v2299_v47 = vadd.f32 %v2383_v3, %v2298_v32  ;;  %v2412_v34 = vpop.f32.mrb[45].mxu0 }
0x25e6   :  { %v2303_v16 = vsel %vm2302_vm7, %v2299_v47, -inf }
0x25e7   :  { %2304 = vmax.xlane.f32.xlu0 %v2303_v16 }
0x2674   :  { %v2305_v21 = vpop.xlane.xlu0 %2304 }
0x2675   :  { %v2306_v33 = vsub.f32 %v2299_v47, %v2305_v21 }
0x2677   :  { %v2307_v52 = vmul.f32 1.442695, %v2306_v33 }
0x2679   :  { %2897 = vpow2.f32 %v2307_v52 }
0x2683   :  { %v2898_v10 = vpop.eup %2897 }
0x2684   :  { %v2309_v54 = vsel %vm2302_vm7, %v2898_v10, 0.0 }
0x2685   :  { %2310 = vadd.xlane.f32.xlu1 %v2309_v54 }
0x2712   :  { %v2311_v56 = vpop.xlane.xlu1 %2310 }
0x2713   :  { %2899 = vrcp.f32 %v2311_v56 }
0x271d   :  { %v2900_v18 = vpop.eup %2899 }
0x271e   :  { %v2313_v55 = vmul.f32 %v2900_v18, %v2898_v10 }
0x2720   :  { %2314 = vst.msk [vmem:[%s3852_s13] sm:$0xff] %vm2302_vm7, %v2313_v55 }

</bundles_post_ra>
